<compile_context>
chip_gen: v7x
topology: tpu7x:2x2x1
jax: 0.10.0
libtpu: 0.0.40
codegen_flags: <defaults>
</compile_context>

<pallas_src>
import math

import jax
import jax.numpy as jnp
from jax.experimental import pallas as pl
from jax.experimental.pallas import tpu as pltpu

OBS_DIM = 32
ACTION_DIM = 8
ACTION_STD_INIT = 0.5
BATCH = 8

_LOG_2PI = math.log(2.0 * math.pi)

# Unpadded torch dims -> lane-padded dims used inside the kernel.
_H1, _H2, _H3 = 500, 300, 100
_H1P, _H2P, _H3P = 512, 384, 128

# Packed bf16 weight slab layout, shape (544, 1024):
#   rows [  0: 32) cols [  0:1024)  fused layer-1 weight  [actor W1 | critic W1]
#   rows [ 32:544) cols [  0: 384)  actor  W2 (512x384, zero padded)
#   rows [ 32:544) cols [384: 768)  critic W2
#   rows [ 32:416) cols [768: 896)  actor  W3 (384x128)
#   rows [ 32:416) cols [896:1024)  critic W3
#   rows [416:544) cols [768: 896)  actor  W4 (128x128, 8 real output lanes)
_W_ROWS = 32 + _H1P          # 544
_W_COLS = 2 * _H1P           # 1024

# f32 aux slab (8, 1024):
#   row 0: fused layer-1 bias   row 1: actor b2   row 2: critic b2
#   row 3: actor b3             row 4: critic b3  row 5: actor b4
#   row 6: critic W4 as a row (128 lanes, 100 real)
#   row 7: inv_var (128 lanes, 8 real, zeros elsewhere)


def _bf16_tanh_supported():
    # bf16-native EUP on v6e/v7x; v5-class chips have no bf16 VPU/EUP path.
    try:
        kind = jax.devices()[0].device_kind.lower()
    except Exception:
        return True
    return "v5" not in kind


_USE_BF16_TANH = _bf16_tanh_supported()


def _hidden_act(y):
    """tanh of an f32 pre-activation, returned as bf16 ready for the next MXU matmul."""
    if _USE_BF16_TANH:
        return jnp.tanh(y.astype(jnp.bfloat16))       # bf16 EUP tanh (v6e/v7x)
    return jnp.tanh(y).astype(jnp.bfloat16)           # f32 tanh (v5e), cast for MXU


def _actor_critic_kernel(obs_ref, act_ref, w_ref, aux_ref, const_ref, out_ref):
    f32 = jnp.float32
    bf16 = jnp.bfloat16

    x = obs_ref[...].astype(bf16)                                # (bq, 32)

    # ---- fused layer 1: x @ [actor_W1 | critic_W1] -> (bq, 1024) ----------
    z = _hidden_act(jnp.dot(x, w_ref[0:32, :], preferred_element_type=f32)
                    + aux_ref[0:1, :])
    h = z[:, 0:512]            # actor stream (bf16)
    g = z[:, 512:1024]         # critic stream (bf16)

    # ---- layer 2 (512 -> 384) ----------------------------------------------
    h = _hidden_act(jnp.dot(h, w_ref[32:544, 0:384],
                            preferred_element_type=f32) + aux_ref[1:2, 0:384])
    g = _hidden_act(jnp.dot(g, w_ref[32:544, 384:768],
                            preferred_element_type=f32) + aux_ref[2:3, 0:384])

    # ---- layer 3 (384 -> 128) ----------------------------------------------
    h = _hidden_act(jnp.dot(h, w_ref[32:416, 768:896],
                            preferred_element_type=f32) + aux_ref[3:4, 0:128])
    g = _hidden_act(jnp.dot(g, w_ref[32:416, 896:1024],
                            preferred_element_type=f32) + aux_ref[4:5, 0:128])

    # ---- actor head (128 -> 128, lanes [0:8) real) -> mean, f32 tanh -------
    mean = jnp.tanh(jnp.dot(h, w_ref[416:544, 768:896],
                            preferred_element_type=f32) + aux_ref[5:6, 0:128])

    # ---- critic head: single useful lane -> VPU multiply + lane reduce -----
    val = jnp.sum(g.astype(f32) * aux_ref[6:7, 0:128],
                  axis=-1, keepdims=True) + const_ref[1]

    # ---- diag-Gaussian log_prob on the 8 real action lanes ------------------
    diff = act_ref[...] - mean[:, 0:ACTION_DIM]                  # (bq, 8)
    quad = jnp.sum(diff * diff * aux_ref[7:8, 0:ACTION_DIM],
                   axis=-1, keepdims=True)
    logp = -0.5 * quad + const_ref[0]

    # ---- narrow output slab: lane 0 = logp, lane 1 = value ------------------
    lane = jax.lax.broadcasted_iota(jnp.int32, out_ref.shape, 1)
    out = jnp.where(lane == 0, logp, 0.0)
    out_ref[...] = jnp.where(lane == 1, val, out)


@jax.jit
def evaluate_pallas(obs, action, w_slab, aux, consts, entropy_const):
    """Returns (logprobs (B,), values (B,1), entropy (B,)) — torch evaluate()."""
    b = obs.shape[0]
    # Batch tile: cap at 128 (full MXU M on v5e, halves live f32 intermediates)
    # and split into >=2 blocks whenever B > 128 so the "parallel" grid can use
    # both v7x TensorCores and overlap obs/act/out DMAs with compute.  The
    # packed weight/aux slabs stay VMEM-resident (index_map always (0, 0)).
    if b > 128:
        half = -(-b // 2)
        bq = min(128, -(-half // 8) * 8)
    else:
        bq = -(-b // 8) * 8
    bp = -(-b // bq) * bq

    obs32 = obs.astype(jnp.float32)
    act32 = action.astype(jnp.float32)
    if bp != b:
        obs_p = jnp.zeros((bp, OBS_DIM), jnp.float32).at[:b].set(obs32)
        act_p = jnp.zeros((bp, ACTION_DIM), jnp.float32).at[:b].set(act32)
    else:
        obs_p, act_p = obs32, act32

    # Advisory cost so XLA overlaps surrounding PPO math with the kernel.
    flops = 2 * bp * (32 * 1024 + 2 * 512 * 384 + 2 * 384 * 128 + 128 * 128)
    transcendentals = bp * (1024 + 2 * 384 + 2 * 128 + 128)
    bytes_accessed = (bp * (OBS_DIM * 4 + ACTION_DIM * 4 + 8 * 4)
                      + _W_ROWS * _W_COLS * 2 + 8 * _W_COLS * 4)

    out = pl.pallas_call(
        _actor_critic_kernel,
        out_shape=jax.ShapeDtypeStruct((bp, 8), jnp.float32),
        grid=(bp // bq,),
        in_specs=[
            pl.BlockSpec((bq, OBS_DIM), lambda i: (i, 0)),
            pl.BlockSpec((bq, ACTION_DIM), lambda i: (i, 0)),
            pl.BlockSpec((_W_ROWS, _W_COLS), lambda i: (0, 0)),   # resident weights
            pl.BlockSpec((8, _W_COLS), lambda i: (0, 0)),         # resident aux
            pl.BlockSpec(memory_space=pltpu.MemorySpace.SMEM),    # scalar constants
        ],
        out_specs=pl.BlockSpec((bq, 8), lambda i: (i, 0)),
        compiler_params=pltpu.CompilerParams(
            dimension_semantics=("parallel",)),
        cost_estimate=pl.CostEstimate(flops=flops,
                                      transcendentals=transcendentals,
                                      bytes_accessed=bytes_accessed),
    )(obs_p, act_p, w_slab, aux, consts)

    logp = out[:b, 0]
    values = out[:b, 1:2]
    entropy = jnp.full((b,), entropy_const, jnp.float32)
    return logp, values, entropy


# ---------------------------------------------------------------------------
# deterministic parameter init (PyTorch-style U(-1/sqrt(fan_in), 1/sqrt(fan_in)))
# ---------------------------------------------------------------------------
def _init_linear(key, fan_in, fan_out):
    kw, kb = jax.random.split(key)
    bound = 1.0 / math.sqrt(fan_in)
    w = jax.random.uniform(kw, (fan_in, fan_out), jnp.float32, -bound, bound)
    b = jax.random.uniform(kb, (1, fan_out), jnp.float32, -bound, bound)
    return w, b


def make_params(key):
    actor_dims = [(OBS_DIM, _H1), (_H1, _H2), (_H2, _H3), (_H3, ACTION_DIM)]
    critic_dims = [(OBS_DIM, _H1), (_H1, _H2), (_H2, _H3), (_H3, 1)]
    keys = jax.random.split(key, len(actor_dims) + len(critic_dims))
    actor = [_init_linear(keys[i], fi, fo) for i, (fi, fo) in enumerate(actor_dims)]
    critic = [_init_linear(keys[len(actor_dims) + i], fi, fo)
              for i, (fi, fo) in enumerate(critic_dims)]
    return actor, critic


def pack_params(actor, critic, cov_var):
    """Pack all params into (bf16 weight slab, f32 aux slab, SMEM consts, entropy)."""
    (aw1, ab1), (aw2, ab2), (aw3, ab3), (aw4, ab4) = actor
    (cw1, cb1), (cw2, cb2), (cw3, cb3), (cw4, cb4) = critic

    w = jnp.zeros((_W_ROWS, _W_COLS), jnp.float32)
    w = w.at[0:OBS_DIM, 0:_H1].set(aw1)
    w = w.at[0:OBS_DIM, _H1P:_H1P + _H1].set(cw1)
    w = w.at[32:32 + _H1, 0:_H2].set(aw2)
    w = w.at[32:32 + _H1, 384:384 + _H2].set(cw2)
    w = w.at[32:32 + _H2, 768:768 + _H3].set(aw3)
    w = w.at[32:32 + _H2, 896:896 + _H3].set(cw3)
    w = w.at[416:416 + _H3, 768:768 + ACTION_DIM].set(aw4)
    w_slab = w.astype(jnp.bfloat16)

    aux = jnp.zeros((8, _W_COLS), jnp.float32)
    aux = aux.at[0, 0:_H1].set(ab1[0])
    aux = aux.at[0, _H1P:_H1P + _H1].set(cb1[0])
    aux = aux.at[1, 0:_H2].set(ab2[0])
    aux = aux.at[2, 0:_H2].set(cb2[0])
    aux = aux.at[3, 0:_H3].set(ab3[0])
    aux = aux.at[4, 0:_H3].set(cb3[0])
    aux = aux.at[5, 0:ACTION_DIM].set(ab4[0])
    aux = aux.at[6, 0:_H3].set(cw4[:, 0])
    aux = aux.at[7, 0:ACTION_DIM].set(1.0 / cov_var)     # zero on padded lanes

    logdet = jnp.sum(jnp.log(cov_var))
    d = float(ACTION_DIM)
    consts = jnp.stack([-0.5 * (logdet + d * _LOG_2PI),
                        cb4[0, 0]]).astype(jnp.float32)
    entropy_const = 0.5 * (logdet + d * (1.0 + _LOG_2PI))
    return w_slab, aux, consts, entropy_const


# ---------------------------------------------------------------------------
# pure-JAX reference mirroring the kernel numerics (bf16 weights / matmul
# inputs, bf16 hidden tanh on v6e/v7x, f32 accumulation / heads / epilogue)
# ---------------------------------------------------------------------------
def evaluate_reference(obs, action, actor, critic, cov_var):
    f32, bf = jnp.float32, jnp.bfloat16

    def pre(x, w, b):
        return jnp.dot(x.astype(bf), w.astype(bf),
                       preferred_element_type=f32) + b

    # actor
    h = obs.astype(f32)
    for w, b in actor[:-1]:
        h = _hidden_act(pre(h, w, b))
    aw4, ab4 = actor[-1]
    mean = jnp.tanh(pre(h, aw4, ab4))                    # f32 head tanh

    # critic
    g = obs.astype(f32)
    for w, b in critic[:-1]:
        g = _hidden_act(pre(g, w, b))
    cw4, cb4 = critic[-1]
    values = jnp.dot(g.astype(f32), cw4, preferred_element_type=f32) + cb4

    var = cov_var.reshape(1, -1)
    diff = action - mean
    quad = jnp.sum(diff * diff / var, axis=-1)
    logdet = jnp.sum(jnp.log(var))
    d = float(ACTION_DIM)
    logp = -0.5 * (quad + logdet + d * _LOG_2PI)
    ent = jnp.full((obs.shape[0],), 0.5 * (logdet + d * (1.0 + _LOG_2PI)))
    return logp, values, ent


if __name__ == "__main__":
    key = jax.random.PRNGKey(0)
    kp, ko, ka = jax.random.split(key, 3)

    actor_params, critic_params = make_params(kp)
    cov_var = jnp.full((ACTION_DIM,), ACTION_STD_INIT, jnp.float32)
    w_slab, aux, consts, entropy_const = pack_params(actor_params, critic_params, cov_var)

    obs = jax.random.normal(ko, (BATCH, OBS_DIM), jnp.float32)
    action = jax.random.normal(ka, (BATCH, ACTION_DIM), jnp.float32)

    logp, values, entropy = evaluate_pallas(obs, action, w_slab, aux, consts,
                                            entropy_const)
    jax.block_until_ready((logp, values, entropy))

    logp_r, values_r, entropy_r = evaluate_reference(
        obs, action, actor_params, critic_params, cov_var)

    assert logp.shape == (BATCH,) and values.shape == (BATCH, 1) and entropy.shape == (BATCH,)
    assert jnp.allclose(logp, logp_r, atol=5e-3, rtol=5e-3)
    assert jnp.allclose(values, values_r, atol=5e-3, rtol=5e-3)
    assert jnp.allclose(entropy, entropy_r, atol=1e-5, rtol=1e-5)

    print("KERNEL_OK")
</pallas_src>

<mosaic_0001>
module attributes {stable_mosaic.version = 11 : i64} {
  func.func @_actor_critic_kernel(%arg0: i32, %arg1: memref<8x32xf32, #tpu.memory_space<vmem>>, %arg2: memref<8x8xf32, #tpu.memory_space<vmem>>, %arg3: memref<544x1024xbf16, #tpu.memory_space<vmem>>, %arg4: memref<8x1024xf32, #tpu.memory_space<vmem>>, %arg5: memref<2xf32, #tpu.memory_space<smem>>, %arg6: memref<8x8xf32, #tpu.memory_space<vmem>>) attributes {dimension_semantics = [#tpu.dimension_semantics<parallel>], iteration_bounds = array<i64: 1>, scalar_prefetch = 0 : i64, scratch_operands = 0 : i64, tpu.core_type = #tpu.core_type<tc>, window_params = [{transform_indices = @transform_0, window_bounds = array<i64: 8, 32>}, {transform_indices = @transform_1, window_bounds = array<i64: 8, 8>}, {pipeline_mode = #tpu.pipeline_mode<synchronous>, transform_indices = @transform_2, window_bounds = array<i64: 544, 1024>}, {pipeline_mode = #tpu.pipeline_mode<synchronous>, transform_indices = @transform_3, window_bounds = array<i64: 8, 1024>}, {transform_indices = @transform_4, window_bounds = array<i64: 2>}, {transform_indices = @transform_5, window_bounds = array<i64: 8, 8>}]} {
    %c0 = arith.constant 0 : index
    %c0_0 = arith.constant 0 : index
    %0 = vector.load %arg1[%c0, %c0_0] : memref<8x32xf32, #tpu.memory_space<vmem>>, vector<8x32xf32>
    %1 = arith.truncf %0 : vector<8x32xf32> to vector<8x32xbf16>
    %c0_1 = arith.constant 0 : index
    %c0_2 = arith.constant 0 : index
    %2 = vector.load %arg3[%c0_1, %c0_2] : memref<544x1024xbf16, #tpu.memory_space<vmem>>, vector<32x1024xbf16>
    %cst = arith.constant dense<0.000000e+00> : vector<8x1024xf32>
    %3 = tpu.matmul %1, %2, %cst {dimension_numbers = #tpu.dot_dimension_numbers<[1], [0], [0], [1], [0, 0, 1, 1], [], []>} : vector<8x32xbf16>, vector<32x1024xbf16>, vector<8x1024xf32> -> vector<8x1024xf32>
    %c0_3 = arith.constant 0 : index
    %c0_4 = arith.constant 0 : index
    %4 = vector.load %arg4[%c0_3, %c0_4] : memref<8x1024xf32, #tpu.memory_space<vmem>>, vector<1x1024xf32>
    %5 = vector.broadcast %4 : vector<1x1024xf32> to vector<8x1024xf32>
    %6 = arith.addf %3, %5 : vector<8x1024xf32>
    %7 = arith.truncf %6 : vector<8x1024xf32> to vector<8x1024xbf16>
    %8 = math.tanh %7 : vector<8x1024xbf16>
    %9 = vector.extract_strided_slice %8 {offsets = [0, 0], sizes = [8, 512], strides = [1, 1]} : vector<8x1024xbf16> to vector<8x512xbf16>
    %10 = vector.extract_strided_slice %8 {offsets = [0, 512], sizes = [8, 512], strides = [1, 1]} : vector<8x1024xbf16> to vector<8x512xbf16>
    %c32 = arith.constant 32 : index
    %c0_5 = arith.constant 0 : index
    %11 = vector.load %arg3[%c32, %c0_5] : memref<544x1024xbf16, #tpu.memory_space<vmem>>, vector<512x384xbf16>
    %cst_6 = arith.constant dense<0.000000e+00> : vector<8x384xf32>
    %12 = tpu.matmul %9, %11, %cst_6 {dimension_numbers = #tpu.dot_dimension_numbers<[1], [0], [0], [1], [0, 0, 1, 1], [], []>} : vector<8x512xbf16>, vector<512x384xbf16>, vector<8x384xf32> -> vector<8x384xf32>
    %c1 = arith.constant 1 : index
    %c0_7 = arith.constant 0 : index
    %13 = vector.load %arg4[%c1, %c0_7] : memref<8x1024xf32, #tpu.memory_space<vmem>>, vector<1x384xf32>
    %14 = vector.broadcast %13 : vector<1x384xf32> to vector<8x384xf32>
    %15 = arith.addf %12, %14 : vector<8x384xf32>
    %16 = arith.truncf %15 : vector<8x384xf32> to vector<8x384xbf16>
    %17 = math.tanh %16 : vector<8x384xbf16>
    %c32_8 = arith.constant 32 : index
    %c384 = arith.constant 384 : index
    %18 = vector.load %arg3[%c32_8, %c384] : memref<544x1024xbf16, #tpu.memory_space<vmem>>, vector<512x384xbf16>
    %cst_9 = arith.constant dense<0.000000e+00> : vector<8x384xf32>
    %19 = tpu.matmul %10, %18, %cst_9 {dimension_numbers = #tpu.dot_dimension_numbers<[1], [0], [0], [1], [0, 0, 1, 1], [], []>} : vector<8x512xbf16>, vector<512x384xbf16>, vector<8x384xf32> -> vector<8x384xf32>
    %c2 = arith.constant 2 : index
    %c0_10 = arith.constant 0 : index
    %20 = vector.load %arg4[%c2, %c0_10] : memref<8x1024xf32, #tpu.memory_space<vmem>>, vector<1x384xf32>
    %21 = vector.broadcast %20 : vector<1x384xf32> to vector<8x384xf32>
    %22 = arith.addf %19, %21 : vector<8x384xf32>
    %23 = arith.truncf %22 : vector<8x384xf32> to vector<8x384xbf16>
    %24 = math.tanh %23 : vector<8x384xbf16>
    %c32_11 = arith.constant 32 : index
    %c768 = arith.constant 768 : index
    %25 = vector.load %arg3[%c32_11, %c768] : memref<544x1024xbf16, #tpu.memory_space<vmem>>, vector<384x128xbf16>
    %cst_12 = arith.constant dense<0.000000e+00> : vector<8x128xf32>
    %26 = tpu.matmul %17, %25, %cst_12 {dimension_numbers = #tpu.dot_dimension_numbers<[1], [0], [0], [1], [0, 0, 1, 1], [], []>} : vector<8x384xbf16>, vector<384x128xbf16>, vector<8x128xf32> -> vector<8x128xf32>
    %c3 = arith.constant 3 : index
    %c0_13 = arith.constant 0 : index
    %27 = vector.load %arg4[%c3, %c0_13] : memref<8x1024xf32, #tpu.memory_space<vmem>>, vector<1x128xf32>
    %28 = vector.broadcast %27 : vector<1x128xf32> to vector<8x128xf32>
    %29 = arith.addf %26, %28 : vector<8x128xf32>
    %30 = arith.truncf %29 : vector<8x128xf32> to vector<8x128xbf16>
    %31 = math.tanh %30 : vector<8x128xbf16>
    %c32_14 = arith.constant 32 : index
    %c896 = arith.constant 896 : index
    %32 = vector.load %arg3[%c32_14, %c896] : memref<544x1024xbf16, #tpu.memory_space<vmem>>, vector<384x128xbf16>
    %cst_15 = arith.constant dense<0.000000e+00> : vector<8x128xf32>
    %33 = tpu.matmul %24, %32, %cst_15 {dimension_numbers = #tpu.dot_dimension_numbers<[1], [0], [0], [1], [0, 0, 1, 1], [], []>} : vector<8x384xbf16>, vector<384x128xbf16>, vector<8x128xf32> -> vector<8x128xf32>
    %c4 = arith.constant 4 : index
    %c0_16 = arith.constant 0 : index
    %34 = vector.load %arg4[%c4, %c0_16] : memref<8x1024xf32, #tpu.memory_space<vmem>>, vector<1x128xf32>
    %35 = vector.broadcast %34 : vector<1x128xf32> to vector<8x128xf32>
    %36 = arith.addf %33, %35 : vector<8x128xf32>
    %37 = arith.truncf %36 : vector<8x128xf32> to vector<8x128xbf16>
    %38 = math.tanh %37 : vector<8x128xbf16>
    %c416 = arith.constant 416 : index
    %c768_17 = arith.constant 768 : index
    %39 = vector.load %arg3[%c416, %c768_17] : memref<544x1024xbf16, #tpu.memory_space<vmem>>, vector<128x128xbf16>
    %cst_18 = arith.constant dense<0.000000e+00> : vector<8x128xf32>
    %40 = tpu.matmul %31, %39, %cst_18 {dimension_numbers = #tpu.dot_dimension_numbers<[1], [0], [0], [1], [0, 0, 1, 1], [], []>} : vector<8x128xbf16>, vector<128x128xbf16>, vector<8x128xf32> -> vector<8x128xf32>
    %c5 = arith.constant 5 : index
    %c0_19 = arith.constant 0 : index
    %41 = vector.load %arg4[%c5, %c0_19] : memref<8x1024xf32, #tpu.memory_space<vmem>>, vector<1x128xf32>
    %42 = vector.broadcast %41 : vector<1x128xf32> to vector<8x128xf32>
    %43 = arith.addf %40, %42 : vector<8x128xf32>
    %44 = math.tanh %43 : vector<8x128xf32>
    %45 = arith.extf %38 : vector<8x128xbf16> to vector<8x128xf32>
    %c6 = arith.constant 6 : index
    %c0_20 = arith.constant 0 : index
    %46 = vector.load %arg4[%c6, %c0_20] : memref<8x1024xf32, #tpu.memory_space<vmem>>, vector<1x128xf32>
    %47 = vector.broadcast %46 : vector<1x128xf32> to vector<8x128xf32>
    %48 = arith.mulf %45, %47 : vector<8x128xf32>
    %cst_21 = arith.constant dense<0.000000e+00> : vector<8xf32>
    %49 = vector.multi_reduction <add>, %48, %cst_21 [1] : vector<8x128xf32> to vector<8xf32>
    %50 = vector.shape_cast %49 : vector<8xf32> to vector<8x1xf32>
    %c1_22 = arith.constant 1 : index
    %51 = memref.load %arg5[%c1_22] : memref<2xf32, #tpu.memory_space<smem>>
    %52 = vector.broadcast %51 : f32 to vector<8x1xf32>
    %53 = arith.addf %50, %52 : vector<8x1xf32>
    %c0_23 = arith.constant 0 : index
    %c0_24 = arith.constant 0 : index
    %54 = vector.load %arg2[%c0_23, %c0_24] : memref<8x8xf32, #tpu.memory_space<vmem>>, vector<8x8xf32>
    %55 = vector.extract_strided_slice %44 {offsets = [0, 0], sizes = [8, 8], strides = [1, 1]} : vector<8x128xf32> to vector<8x8xf32>
    %56 = arith.subf %54, %55 : vector<8x8xf32>
    %57 = arith.mulf %56, %56 : vector<8x8xf32>
    %c7 = arith.constant 7 : index
    %c0_25 = arith.constant 0 : index
    %58 = vector.load %arg4[%c7, %c0_25] : memref<8x1024xf32, #tpu.memory_space<vmem>>, vector<1x8xf32>
    %59 = vector.broadcast %58 : vector<1x8xf32> to vector<8x8xf32>
    %60 = arith.mulf %57, %59 : vector<8x8xf32>
    %cst_26 = arith.constant dense<0.000000e+00> : vector<8xf32>
    %61 = vector.multi_reduction <add>, %60, %cst_26 [1] : vector<8x8xf32> to vector<8xf32>
    %62 = vector.shape_cast %61 : vector<8xf32> to vector<8x1xf32>
    %cst_27 = arith.constant -5.000000e-01 : f32
    %63 = vector.broadcast %cst_27 : f32 to vector<8x1xf32>
    %64 = arith.mulf %63, %62 : vector<8x1xf32>
    %c0_28 = arith.constant 0 : index
    %65 = memref.load %arg5[%c0_28] : memref<2xf32, #tpu.memory_space<smem>>
    %66 = vector.broadcast %65 : f32 to vector<8x1xf32>
    %67 = arith.addf %64, %66 : vector<8x1xf32>
    %68 = tpu.iota {dimensions = array<i32: 1>} : vector<8x8xi32>
    %c0_i32 = arith.constant 0 : i32
    %69 = vector.broadcast %c0_i32 : i32 to vector<8x8xi32>
    %70 = arith.cmpi eq, %68, %69 : vector<8x8xi32>
    %cst_29 = arith.constant 0.000000e+00 : f32
    %71 = vector.shape_cast %67 : vector<8x1xf32> to vector<8x1xf32>
    %72 = vector.broadcast %71 : vector<8x1xf32> to vector<8x8xf32>
    %73 = vector.broadcast %cst_29 : f32 to vector<8x8xf32>
    %74 = arith.select %70, %72, %73 : vector<8x8xi1>, vector<8x8xf32>
    %c1_i32 = arith.constant 1 : i32
    %75 = vector.broadcast %c1_i32 : i32 to vector<8x8xi32>
    %76 = arith.cmpi eq, %68, %75 : vector<8x8xi32>
    %77 = vector.shape_cast %53 : vector<8x1xf32> to vector<8x1xf32>
    %78 = vector.broadcast %77 : vector<8x1xf32> to vector<8x8xf32>
    %79 = arith.select %76, %78, %74 : vector<8x8xi1>, vector<8x8xf32>
    %c0_30 = arith.constant 0 : index
    %c0_31 = arith.constant 0 : index
    %80 = vector.load %arg6[%c0_30, %c0_31] : memref<8x8xf32, #tpu.memory_space<vmem>>, vector<8x8xf32>
    tpu.vector_store %arg6[%c0_30, %c0_31], %79 {strides = array<i32>} : memref<8x8xf32, #tpu.memory_space<vmem>>, vector<8x8xf32>,
    return
  }
  func.func @transform_0(%arg0: i32) -> (i32, i32) {
    %c0_i32 = arith.constant 0 : i32
    %c0_i32_0 = arith.constant 0 : i32
    return %arg0, %c0_i32 : i32, i32
  }
  func.func @transform_1(%arg0: i32) -> (i32, i32) {
    %c0_i32 = arith.constant 0 : i32
    %c0_i32_0 = arith.constant 0 : i32
    return %arg0, %c0_i32 : i32, i32
  }
  func.func @transform_2(%arg0: i32) -> (i32, i32) {
    %c0_i32 = arith.constant 0 : i32
    %c0_i32_0 = arith.constant 0 : i32
    %c0_i32_1 = arith.constant 0 : i32
    return %c0_i32, %c0_i32_0 : i32, i32
  }
  func.func @transform_3(%arg0: i32) -> (i32, i32) {
    %c0_i32 = arith.constant 0 : i32
    %c0_i32_0 = arith.constant 0 : i32
    %c0_i32_1 = arith.constant 0 : i32
    return %c0_i32, %c0_i32_0 : i32, i32
  }
  func.func @transform_4(%arg0: i32) -> i32 {
    %c0_i32 = arith.constant 0 : i32
    %c0_i32_0 = arith.constant 0 : i32
    return %c0_i32 : i32
  }
  func.func @transform_5(%arg0: i32) -> (i32, i32) {
    %c0_i32 = arith.constant 0 : i32
    %c0_i32_0 = arith.constant 0 : i32
    return %arg0, %c0_i32 : i32, i32
  }
}

</mosaic_0001>

<bundles_post_ra>
// kernel: evaluate_pallas.1
= control target key start
LH: loop header
LB: loop body
LE: loop exit
PB: predicated region body
PF: predicated region fallthrough
CT: control target
= control target key end

     0   :  { %10 = vsyncpa [#allocation3], 0  ;;  %s3618_s0 = inlined_call_operand.hbm [shape: f32[8,32], index: 0, kind: input, shape index: {}]   ;;  %s3619_s1 = inlined_call_operand.hbm [shape: f32[8,8], index: 1, kind: input, shape index: {}]   ;;  %s3620_s2 = inlined_call_operand.hbm [shape: bf16[544,1024], index: 2, kind: input, shape index: {}]   ;;  %s3621_s3 = inlined_call_operand.hbm [shape: f32[8,1024], index: 3, kind: input, shape index: {}]   ;;  %s3622_s4 = inlined_call_operand.hbm [shape: f32[2], index: 4, kind: input, shape index: {}]   ;;  %s3623_s5 = inlined_call_operand.vmem [shape: f32[8,8], index: 5, kind: output, shape index: {}]  }
   0x1   :  { %11 = vsyncpa [#allocation6], 0 }
   0x2   :  { %12 = vsyncpa [#allocation9], 0 }
   0x3   :  { %13 = vsyncpa [#allocation4], 0  ;;  %s3401_s18 = smov [#allocation5]   ;;  %s3402_s20 = smov [#allocation2]  }
   0x4   :  { %s30_s19 = sshll.u32 %s3401_s18, 4  ;;  %s20_s21 = sshll.u32 %s3402_s20, 4  ;;  %s31_s19 = int_to_ptr.vmem [resolvable:$true] %s30_s19  ;;  %s21_s21 = int_to_ptr.vmem [resolvable:$true] %s20_s21 }
   0x5   :  { %s3295_s24 = scalar_lea.hbm %s3619_s1, 128 }
   0x6   :  { %p3296_p0 = scmp.ne.s32.totalorder %s3619_s1, %s3295_s24  ;;  %p3299_p1 = scmp.lt.u32.totalorder %s3295_s24, %s3619_s1 }
   0x8   :  { %p3301_p2 = pnand %p3299_p1, %p3296_p0 }
   0xa   :  { %3304 = shalt.err (!%p3301_p2)
}
   0xb   :  { %s3305_s29 = scalar_lea.vmem %s31_s19, 128  ;;  %p3310_p4 = scmp.lt.s32.totalorder %s31_s19, %s31_s19 }
   0xc   :  { %p3306_p3 = scmp.ne.s32.totalorder %s31_s19, %s3305_s29  ;;  %p3311_p5 = scmp.lt.s32.totalorder %s3305_s29, %s3305_s29 }
   0xe   :  { %p3312_p6 = por %p3311_p5, %p3310_p4 }
  0x10   :  { %p3313_p7 = pnand %p3312_p6, %p3306_p3 }
  0x12   :  { %3316 = shalt.err (!%p3313_p7)
}
  0x13   :  { %33 = dma.hbm_to_vmem [thread:$0]  %s3619_s1, 128, %s31_s19, [#allocation6]  }
  0x14   :  { %s3317_s9 = scalar_lea.hbm %s3618_s0, 128 }
  0x15   :  { %p3318_p8 = scmp.ne.s32.totalorder %s3618_s0, %s3317_s9  ;;  %p3321_p9 = scmp.lt.u32.totalorder %s3317_s9, %s3618_s0 }
  0x17   :  { %p3323_p10 = pnand %p3321_p9, %p3318_p8 }
  0x19   :  { %3326 = shalt.err (!%p3323_p10)
}
  0x1a   :  { %s3327_s14 = scalar_lea.vmem %s21_s21, 128  ;;  %p3332_p12 = scmp.lt.s32.totalorder %s21_s21, %s21_s21 }
  0x1b   :  { %p3328_p11 = scmp.ne.s32.totalorder %s21_s21, %s3327_s14  ;;  %p3333_p13 = scmp.lt.s32.totalorder %s3327_s14, %s3327_s14 }
  0x1d   :  { %p3334_p0 = por %p3333_p13, %p3332_p12 }
  0x1f   :  { %p3335_p1 = pnand %p3334_p0, %p3328_p11 }
  0x21   :  { %3338 = shalt.err (!%p3335_p1)
}
  0x22   :  { %23 = dma.hbm_to_vmem [thread:$0]  %s3618_s0, 128, %s21_s21, [#allocation3]  }
  0x23   :  { %s3403_s16 = smov [#allocation7]   ;;  %s3339_s20 = scalar_lea.hbm %s3620_s2, 34816 }
  0x24   :  { %s39_s17 = sshll.u32 %s3403_s16, 4  ;;  %p3340_p2 = scmp.ne.s32.totalorder %s3620_s2, %s3339_s20  ;;  %s40_s17 = int_to_ptr.vmem [resolvable:$true] %s39_s17 }
  0x25   :  { %p3343_p3 = scmp.lt.u32.totalorder %s3339_s20, %s3620_s2 }
  0x27   :  { %p3345_p4 = pnand %p3343_p3, %p3340_p2 }
  0x29   :  { %3348 = shalt.err (!%p3345_p4)
}
  0x2a   :  { %s3349_s26 = scalar_lea.vmem %s40_s17, 34816  ;;  %p3354_p6 = scmp.lt.s32.totalorder %s40_s17, %s40_s17 }
  0x2b   :  { %p3350_p5 = scmp.ne.s32.totalorder %s40_s17, %s3349_s26  ;;  %p3355_p7 = scmp.lt.s32.totalorder %s3349_s26, %s3349_s26 }
  0x2d   :  { %p3356_p8 = por %p3355_p7, %p3354_p6 }
  0x2f   :  { %p3357_p9 = pnand %p3356_p8, %p3350_p5 }
  0x31   :  { %3360 = shalt.err (!%p3357_p9)
}
  0x32   :  { %s3404_s0 = smov 512   ;;  %s3405_s21 = smov 32  }
  0x33   :  { %45 = dma.hbm_to_vmem [thread:$0]  %s3620_s2, 34816, %s40_s17, [#allocation6], %s3404_s0, %s3404_s0, %s3405_s21  }
  0x34   :  { %s3406_s29 = smov [#allocation8]   ;;  %s3361_s8 = scalar_lea.hbm %s3621_s3, 1024 }
  0x35   :  { %s52_s30 = sshll.u32 %s3406_s29, 4  ;;  %p3362_p10 = scmp.ne.s32.totalorder %s3621_s3, %s3361_s8  ;;  %s53_s30 = int_to_ptr.vmem [resolvable:$true] %s52_s30 }
  0x36   :  { %p3365_p11 = scmp.lt.u32.totalorder %s3361_s8, %s3621_s3 }
  0x38   :  { %p3367_p12 = pnand %p3365_p11, %p3362_p10 }
  0x3a   :  { %3370 = shalt.err (!%p3367_p12)
}
  0x3b   :  { %s3371_s13 = scalar_lea.vmem %s53_s30, 1024  ;;  %p3376_p0 = scmp.lt.s32.totalorder %s53_s30, %s53_s30 }
  0x3c   :  { %p3372_p13 = scmp.ne.s32.totalorder %s53_s30, %s3371_s13  ;;  %p3377_p1 = scmp.lt.s32.totalorder %s3371_s13, %s3371_s13 }
  0x3e   :  { %p3378_p2 = por %p3377_p1, %p3376_p0 }
  0x40   :  { %p3379_p3 = pnand %p3378_p2, %p3372_p13 }
  0x42   :  { %3382 = shalt.err (!%p3379_p3)
}
  0x43   :  { %55 = dma.hbm_to_vmem [thread:$0]  %s3621_s3, 1024, %s53_s30, [#allocation9]  }
  0x44   :  { %s3383_s16 = scalar_lea.hbm %s3622_s4, 16 }
  0x45   :  { %p3384_p4 = scmp.ne.s32.totalorder %s3622_s4, %s3383_s16  ;;  %p3387_p5 = scmp.lt.u32.totalorder %s3383_s16, %s3622_s4 }
  0x47   :  { %p3389_p6 = pnand %p3387_p5, %p3384_p4 }
  0x49   :  { %3392 = shalt.err (!%p3389_p6)
}
  0x4a   :  { %s3407_s22 = smov [#allocation10]  }
  0x4b   :  { %63 = dma.hbm_to_smem %s3622_s4, 16, %s3407_s22, [#allocation4]  }
  0x4c   :  { %3393 = dma.done.wait [#allocation3], 128  }
  0x4d   :  { %3394 = vsyncadd [#allocation3], 4294967168 }
  0x4e   :  { %3395 = dma.done.wait [#allocation6], 34944  }
  0x4f   :  { %3396 = vsyncadd [#allocation6], 4294932352 }
  0x50   :  { %3397 = dma.done.wait [#allocation9], 1024  }
  0x51   :  { %3398 = vsyncadd [#allocation9], 4294966272 }
  0x52   :  { %3399 = dma.done.wait [#allocation4], 16  }
  0x53   :  { %3400 = vsyncadd [#allocation4], 4294967280 }
  0x54   :  { %79 = sfence }
  0x55   :  { %v83_v0 = vld [vmem:[#allocation7] sm:$0xff]  ;;  %v3408_v6 = vmov 0   ;;  %v84_v8 = vld [vmem:[#allocation7 + $0x8] sm:$0xff]  ;;  %v81_v11 = vld [vmem:[#allocation2] sm:$0xff]  ;;  %vm223_vm0 = vcmask 261120   ;;  %vm3410_vm1 = vmmov 0  }
  0x56   :  { %v87_v1 = vld [vmem:[#allocation7 + $0x20] sm:$0xff]  ;;  %259 = vmatprep.mubr.bf16.mxu1 %v3408_v6  ;;  %v88_v9 = vld [vmem:[#allocation7 + $0x28] sm:$0xff]  ;;  %v3502_v22 = vpack.c.bf16 %v81_v11, %v81_v11  ;;  %v85_v28 = vld [vmem:[#allocation7 + $0x10] sm:$0xff]  ;;  %vm2728_vm2 = vcmask 64512   ;;  %s2733_s3 = sld [smem:[#allocation10]]  ;;  %s3019_s4 = sld [smem:[#allocation10 + $0x1]] }
  0x57   :  { %v91_v2 = vld [vmem:[#allocation7 + $0x40] sm:$0xff]  ;;  %v2752_v3 = vcombine.high %v83_v0, %v87_v1  ;;  %v2751_v4 = vcombine.low %v83_v0, %v87_v1  ;;  %v2754_v14 = vcombine.high %v84_v8, %v88_v9  ;;  %v92_v19 = vld [vmem:[#allocation7 + $0x48] sm:$0xff]  ;;  %v2753_v25 = vcombine.low %v84_v8, %v88_v9  ;;  %v89_v29 = vld [vmem:[#allocation7 + $0x30] sm:$0xff] }
  0x58   :  { %v95_v5 = vld [vmem:[#allocation7 + $0x60] sm:$0xff]  ;;  %v96_v20 = vld [vmem:[#allocation7 + $0x68] sm:$0xff]  ;;  %v2756_v34 = vcombine.high %v85_v28, %v89_v29  ;;  %v93_v36 = vld [vmem:[#allocation7 + $0x50] sm:$0xff]  ;;  %v2755_v41 = vcombine.low %v85_v28, %v89_v29 }
  0x59   :  { %v2760_v7 = vcombine.high %v91_v2, %v95_v5  ;;  %227 = vmatprep.subr.bf16.mxu1 %v2752_v3  ;;  %v2759_v10 = vcombine.low %v91_v2, %v95_v5  ;;  %v407_v12 = vld [vmem:[#allocation7 + $0x80] sm:$0xff]  ;;  %v2762_v26 = vcombine.high %v92_v19, %v96_v20  ;;  %v2761_v33 = vcombine.low %v92_v19, %v96_v20  ;;  %v97_v37 = vld [vmem:[#allocation7 + $0x70] sm:$0xff]  ;;  %v86_v45 = vld [vmem:[#allocation7 + $0x18] sm:$0xff] }
  0x5a   :  { %228 = vmatpush1.bf16.msra.mxu1 %v2751_v4  ;;  %v409_v13 = vld [vmem:[#allocation7 + $0xa0] sm:$0xff]  ;;  %v2764_v42 = vcombine.high %v93_v36, %v97_v37  ;;  %v90_v46 = vld [vmem:[#allocation7 + $0x38] sm:$0xff]  ;;  %v2763_v49 = vcombine.low %v93_v36, %v97_v37  ;;  %v440_v61 = vld [vmem:[#allocation7 + $0x288] sm:$0xf] }
  0x5b   :  { %229 = vmatprep.subr.bf16.mxu1 %v2760_v7  ;;  %v2772_v15 = vcombine.high %v407_v12, %v409_v13  ;;  %v2771_v16 = vcombine.low %v407_v12, %v409_v13  ;;  %v411_v17 = vld [vmem:[#allocation7 + $0xc0] sm:$0xff]  ;;  %v2758_v51 = vcombine.high %v86_v45, %v90_v46  ;;  %v94_v53 = vld [vmem:[#allocation7 + $0x58] sm:$0xff]  ;;  %v2757_v57 = vcombine.low %v86_v45, %v90_v46  ;;  %v442_v62 = vld [vmem:[#allocation7 + $0x2a8] sm:$0xf] }
  0x5c   :  { %v413_v18 = vld [vmem:[#allocation7 + $0xe0] sm:$0xff]  ;;  %v98_v54 = vld [vmem:[#allocation7 + $0x78] sm:$0xff]  ;;  %v2797_v3 = vcombine.low %v440_v61, %v442_v62  ;;  %v408_v4 = vld [vmem:[#allocation7 + $0x88] sm:$0xf] }
  0x5d   :  { %v2775_v21 = vcombine.high %v411_v17, %v413_v18  ;;  %1065 = vmatprep.subr.bf16.mxu0 %v2772_v15  ;;  %v415_v23 = vld [vmem:[#allocation7 + $0x100] sm:$0xff]  ;;  %v2774_v27 = vcombine.low %v411_v17, %v413_v18  ;;  %v2766_v59 = vcombine.high %v94_v53, %v98_v54  ;;  %v2765_v1 = vcombine.low %v94_v53, %v98_v54  ;;  %v410_v5 = vld [vmem:[#allocation7 + $0xa8] sm:$0xf] }
  0x5e   :  { %v417_v24 = vld [vmem:[#allocation7 + $0x120] sm:$0xff]  ;;  %230 = vmatpush1.bf16.msra.mxu1 %v2759_v10  ;;  %1066 = vmatpush1.bf16.msra.mxu0 %v2771_v16  ;;  %v444_v8 = vld [vmem:[#allocation7 + $0x2c8] sm:$0xf]  ;;  %v2773_v12 = vcombine.low %v408_v4, %v410_v5 }
  0x5f   :  { %268 = vmatprep.subr.bf16.mxu1 %v2754_v14  ;;  %1067 = vmatprep.subr.bf16.mxu0 %v2775_v21  ;;  %v2778_v30 = vcombine.high %v415_v23, %v417_v24  ;;  %v419_v31 = vld [vmem:[#allocation7 + $0x140] sm:$0xff]  ;;  %v2777_v35 = vcombine.low %v415_v23, %v417_v24  ;;  %v446_v9 = vld [vmem:[#allocation7 + $0x2e8] sm:$0xf] }
  0x60   :  { %v421_v32 = vld [vmem:[#allocation7 + $0x160] sm:$0xff]  ;;  %v2800_v14 = vcombine.low %v444_v8, %v446_v9  ;;  %v412_v15 = vld [vmem:[#allocation7 + $0xc8] sm:$0xf] }
  0x61   :  { %2767 = vmatmul.mubr.msk.bf16.vlgmr.msra.gmra.mrb[0].mxu1 %vm223_vm0, %v3502_v22  ;;  %v2781_v38 = vcombine.high %v419_v31, %v421_v32  ;;  %v423_v39 = vld [vmem:[#allocation7 + $0x180] sm:$0xff]  ;;  %v2780_v43 = vcombine.low %v419_v31, %v421_v32  ;;  %v448_v17 = vld [vmem:[#allocation7 + $0x308] sm:$0xf] }
  0x62   :  { %269 = vmatpush1.bf16.msra.mxu1 %v2753_v25  ;;  %300 = vmatprep.mubr.bf16.mxu1 %v3408_v6  ;;  %v425_v40 = vld [vmem:[#allocation7 + $0x1a0] sm:$0xff]  ;;  %v450_v18 = vld [vmem:[#allocation7 + $0x328] sm:$0xf] }
  0x63   :  { %270 = vmatprep.subr.bf16.mxu1 %v2762_v26  ;;  %1068 = vmatpush1.bf16.msra.mxu0 %v2774_v27  ;;  %v2784_v44 = vcombine.high %v423_v39, %v425_v40  ;;  %v427_v47 = vld [vmem:[#allocation7 + $0x1c0] sm:$0xff]  ;;  %v2783_v50 = vcombine.low %v423_v39, %v425_v40  ;;  %v2803_v24 = vcombine.low %v448_v17, %v450_v18  ;;  %v416_v25 = vld [vmem:[#allocation7 + $0x108] sm:$0xf] }
  0x64   :  { %1069 = vmatprep.subr.bf16.mxu0 %v2778_v30  ;;  %v429_v48 = vld [vmem:[#allocation7 + $0x1e0] sm:$0xff]  ;;  %v418_v26 = vld [vmem:[#allocation7 + $0x128] sm:$0xf] }
  0x65   :  { %v2787_v52 = vcombine.high %v427_v47, %v429_v48  ;;  %v431_v55 = vld [vmem:[#allocation7 + $0x200] sm:$0xff]  ;;  %v2786_v58 = vcombine.low %v427_v47, %v429_v48  ;;  %v452_v28 = vld [vmem:[#allocation7 + $0x348] sm:$0xf]  ;;  %v2779_v32 = vcombine.low %v416_v25, %v418_v26 }
  0x66   :  { %271 = vmatpush1.bf16.msra.mxu1 %v2761_v33  ;;  %v433_v56 = vld [vmem:[#allocation7 + $0x220] sm:$0xff]  ;;  %v454_v29 = vld [vmem:[#allocation7 + $0x368] sm:$0xf] }
  0x67   :  { %309 = vmatprep.subr.bf16.mxu1 %v2756_v34  ;;  %1070 = vmatpush1.bf16.msra.mxu0 %v2777_v35  ;;  %v2790_v60 = vcombine.high %v431_v55, %v433_v56  ;;  %v435_v63 = vld [vmem:[#allocation7 + $0x240] sm:$0xff]  ;;  %v2789_v2 = vcombine.low %v431_v55, %v433_v56  ;;  %v2806_v33 = vcombine.low %v452_v28, %v454_v29  ;;  %v420_v34 = vld [vmem:[#allocation7 + $0x148] sm:$0xf] }
  0x68   :  { %1071 = vmatprep.subr.bf16.mxu0 %v2781_v38  ;;  %v437_v0 = vld [vmem:[#allocation7 + $0x260] sm:$0xff]  ;;  %v422_v35 = vld [vmem:[#allocation7 + $0x168] sm:$0xf] }
  0x69   :  { %2768 = vmatmul.mubr.msk.bf16.vlgmr.msra.gmra.mrb[4].mxu1 %vm223_vm0, %v3502_v22  ;;  %v2793_v7 = vcombine.high %v435_v63, %v437_v0  ;;  %v439_v10 = vld [vmem:[#allocation7 + $0x280] sm:$0xff]  ;;  %v2792_v13 = vcombine.low %v435_v63, %v437_v0  ;;  %v2782_v39 = vcombine.low %v420_v34, %v422_v35  ;;  %v456_v45 = vld [vmem:[#allocation7 + $0x388] sm:$0xf] }
  0x6a   :  { %310 = vmatpush1.bf16.msra.mxu1 %v2755_v41  ;;  %341 = vmatprep.mubr.bf16.mxu1 %v3408_v6  ;;  %v441_v11 = vld [vmem:[#allocation7 + $0x2a0] sm:$0xff]  ;;  %v458_v47 = vld [vmem:[#allocation7 + $0x3a8] sm:$0xf] }
  0x6b   :  { %311 = vmatprep.subr.bf16.mxu1 %v2764_v42  ;;  %1072 = vmatpush1.bf16.msra.mxu0 %v2780_v43  ;;  %v2796_v16 = vcombine.high %v439_v10, %v441_v11  ;;  %v443_v19 = vld [vmem:[#allocation7 + $0x2c0] sm:$0xff]  ;;  %v2795_v23 = vcombine.low %v439_v10, %v441_v11  ;;  %v424_v48 = vld [vmem:[#allocation7 + $0x188] sm:$0xf] }
  0x6c   :  { %1073 = vmatprep.subr.bf16.mxu0 %v2784_v44  ;;  %v445_v20 = vld [vmem:[#allocation7 + $0x2e0] sm:$0xff]  ;;  %v460_v55 = vld [vmem:[#allocation7 + $0x3c8] sm:$0xf] }
  0x6d   :  { %v2799_v27 = vcombine.high %v443_v19, %v445_v20  ;;  %v447_v30 = vld [vmem:[#allocation7 + $0x300] sm:$0xff]  ;;  %v432_v5 = vld [vmem:[#allocation7 + $0x208] sm:$0xf] }
  0x6e   :  { %312 = vmatpush1.bf16.msra.mxu1 %v2763_v49  ;;  %v449_v31 = vld [vmem:[#allocation7 + $0x320] sm:$0xff]  ;;  %v426_v49 = vld [vmem:[#allocation7 + $0x1a8] sm:$0xf] }
  0x6f   :  { %1074 = vmatpush1.bf16.msra.mxu0 %v2783_v50  ;;  %350 = vmatprep.subr.bf16.mxu1 %v2758_v51  ;;  %v2802_v36 = vcombine.high %v447_v30, %v449_v31  ;;  %v451_v37 = vld [vmem:[#allocation7 + $0x340] sm:$0xff]  ;;  %v2801_v40 = vcombine.low %v447_v30, %v449_v31  ;;  %v2809_v50 = vcombine.low %v456_v45, %v458_v47 }
  0x70   :  { %1075 = vmatprep.subr.bf16.mxu0 %v2787_v52  ;;  %v453_v38 = vld [vmem:[#allocation7 + $0x360] sm:$0xff]  ;;  %v2785_v52 = vcombine.low %v424_v48, %v426_v49 }
  0x71   :  { %2769 = vmatmul.mubr.msk.bf16.vlgmr.msra.gmra.mrb[8].mxu1 %vm223_vm0, %v3502_v22  ;;  %v2805_v41 = vcombine.high %v451_v37, %v453_v38  ;;  %v2804_v42 = vcombine.low %v451_v37, %v453_v38  ;;  %v455_v43 = vld [vmem:[#allocation7 + $0x380] sm:$0xff] }
  0x72   :  { %351 = vmatpush1.bf16.msra.mxu1 %v2757_v57  ;;  %382 = vmatprep.mubr.bf16.mxu1 %v3408_v6  ;;  %v414_v6 = vld [vmem:[#allocation7 + $0xe8] sm:$0xf]  ;;  %v457_v44 = vld [vmem:[#allocation7 + $0x3a0] sm:$0xff] }
  0x73   :  { %1076 = vmatpush1.bf16.msra.mxu0 %v2786_v58  ;;  %352 = vmatprep.subr.bf16.mxu1 %v2766_v59  ;;  %v2776_v21 = vcombine.low %v412_v15, %v414_v6  ;;  %v2808_v46 = vcombine.high %v455_v43, %v457_v44  ;;  %v2807_v51 = vcombine.low %v455_v43, %v457_v44  ;;  %v459_v53 = vld [vmem:[#allocation7 + $0x3c0] sm:$0xff]  ;;  %v462_v57 = vld [vmem:[#allocation7 + $0x3e8] sm:$0xf] }
  0x74   :  { %1077 = vmatprep.subr.bf16.mxu0 %v2790_v60  ;;  %v461_v54 = vld [vmem:[#allocation7 + $0x3e0] sm:$0xff]  ;;  %v428_v58 = vld [vmem:[#allocation7 + $0x1c8] sm:$0xf]  ;;  %v2812_v60 = vcombine.low %v460_v55, %v462_v57 }
  0x75   :  { %v2811_v56 = vcombine.high %v459_v53, %v461_v54  ;;  %v430_v59 = vld [vmem:[#allocation7 + $0x1e8] sm:$0xf]  ;;  %v2810_v61 = vcombine.low %v459_v53, %v461_v54  ;;  %v463_v63 = vld [vmem:[#allocation7 + $0x400] sm:$0xff] }
  0x76   :  { %353 = vmatpush1.bf16.msra.mxu1 %v2765_v1  ;;  %v2788_v62 = vcombine.low %v428_v58, %v430_v59  ;;  %v465_v0 = vld [vmem:[#allocation7 + $0x420] sm:$0xff]  ;;  %v464_v1 = vld [vmem:[#allocation7 + $0x408] sm:$0xf] }
  0x77   :  { %1078 = vmatpush1.bf16.msra.mxu0 %v2789_v2  ;;  %3020 = vmatprep.subr.bf16.mxu1 %v2797_v3  ;;  %v2814_v2 = vcombine.high %v463_v63, %v465_v0  ;;  %v466_v3 = vld [vmem:[#allocation7 + $0x428] sm:$0xf]  ;;  %v2813_v4 = vcombine.low %v463_v63, %v465_v0  ;;  %v467_v10 = vld [vmem:[#allocation7 + $0x440] sm:$0xff] }
  0x78   :  { %1079 = vmatprep.subr.bf16.mxu0 %v2793_v7  ;;  %v434_v7 = vld [vmem:[#allocation7 + $0x228] sm:$0xf]  ;;  %v2815_v8 = vcombine.low %v464_v1, %v466_v3  ;;  %v469_v11 = vld [vmem:[#allocation7 + $0x460] sm:$0xff] }
  0x79   :  { %2770 = vmatmul.mubr.msk.bf16.vlgmr.msra.gmra.mrb[12].mxu1 %vm223_vm0, %v3502_v22  ;;  %v2798_v22 = vcombine.low %v443_v19, %v445_v20  ;;  %v2791_v9 = vcombine.low %v432_v5, %v434_v7  ;;  %v436_v15 = vld [vmem:[#allocation7 + $0x248] sm:$0xf]  ;;  %v2816_v17 = vcombine.low %v467_v10, %v469_v11  ;;  %v3515_v19 = vld [vmem:[#allocation7 + $0x480] sm:$0xff] }
  0x7a   :  { %3021 = vmatpush3.bf16.msra.mxu1 %v2773_v12  ;;  %v468_v12 = vld [vmem:[#allocation7 + $0x448] sm:$0xf]  ;;  %v473_v20 = vld [vmem:[#allocation7 + $0x4a0] sm:$0xff] }
  0x7b   :  { %1080 = vmatpush1.bf16.msra.mxu0 %v2792_v13  ;;  %3022 = vmatprep.subr.bf16.mxu1 %v2800_v14  ;;  %v2817_v13 = vcombine.high %v467_v10, %v469_v11  ;;  %v470_v14 = vld [vmem:[#allocation7 + $0x468] sm:$0xf]  ;;  %v2819_v25 = vcombine.low %v3515_v19, %v473_v20  ;;  %v475_v53 = vld [vmem:[#allocation7 + $0x4c0] sm:$0xff] }
  0x7c   :  { %1081 = vmatprep.subr.bf16.mxu0 %v2796_v16  ;;  %v438_v6 = vld [vmem:[#allocation7 + $0x268] sm:$0xf]  ;;  %v2818_v16 = vcombine.low %v468_v12, %v470_v14  ;;  %v477_v54 = vld [vmem:[#allocation7 + $0x4e0] sm:$0xff] }
  0x7d   :  { %v2794_v18 = vcombine.low %v436_v15, %v438_v6  ;;  %v99_v29 = vld [vmem:[#allocation8] ss:$8 sm:$0xf] }
  0x7e   :  { %3023 = vmatpush3.bf16.msra.mxu1 %v2776_v21  ;;  %v504_v21 = vld [vmem:[#allocation7 + $0x688] sm:$0xf]  ;;  %v479_v0 = vld [vmem:[#allocation7 + $0x500] sm:$0xff] }
  0x7f   :  { %1082 = vmatpush1.bf16.msra.mxu0 %v2795_v23  ;;  %3024 = vmatprep.subr.bf16.mxu1 %v2803_v24  ;;  %v2820_v23 = vcombine.high %v3515_v19, %v473_v20  ;;  %v506_v24 = vld [vmem:[#allocation7 + $0x6a8] sm:$0xf]  ;;  %v481_v3 = vld [vmem:[#allocation7 + $0x520] sm:$0xff] }
  0x80   :  { %1083 = vmatprep.subr.bf16.mxu0 %v2799_v27  ;;  %v2845_v26 = vcombine.low %v504_v21, %v506_v24  ;;  %v103_v27 = vlaneseq  ;;  %v100_v30 = vld [vmem:[#allocation8] ss:$8 sm:$0xf0]  ;;  %v2826_v11 = vcombine.high %v479_v0, %v481_v3  ;;  %v2825_v19 = vcombine.low %v479_v0, %v481_v3 }
  0x81   :  { %v3522_v31 = vor.u32 %v100_v30, %v99_v29  ;;  %v508_v55 = vld [vmem:[#allocation7 + $0x6c8] sm:$0xf]  ;;  %v483_v15 = vld [vmem:[#allocation7 + $0x540] sm:$0xff] }
  0x82   :  { %3025 = vmatpush3.bf16.msra.mxu1 %v2779_v32  ;;  %v3520_v28 = vshrl.u32 %v103_v27, 7  ;;  %v478_v63 = vld [vmem:[#allocation7 + $0x4e8] sm:$0xf] }
  0x83   :  { %1084 = vmatpush1.bf16.msra.mxu0 %v2798_v22  ;;  %3026 = vmatprep.subr.bf16.mxu1 %v2806_v33  ;;  %v514_v5 = vld [vmem:[#allocation7 + $0x728] sm:$0xf] }
  0x84   :  { %1085 = vmatprep.subr.bf16.mxu0 %v2802_v36  ;;  %v3525_v32 = vsub.s32 0, %v3520_v28  ;;  %v3528_v22 = vsub.s32 1, %v3520_v28  ;;  %v482_v14 = vld [vmem:[#allocation7 + $0x528] sm:$0xf]  ;;  %v3543_v6 = vsub.s32 2, %v3520_v28  ;;  %v125_v21 = vsub.s32 5, %v3520_v28 }
  0x85   :  { %v484_v29 = vld [vmem:[#allocation7 + $0x548] sm:$0xf] }
  0x86   :  { %3027 = vmatpush3.bf16.msra.mxu1 %v2782_v39  ;;  %v106_v33 = vrot.slane %v3522_v31, %v3525_v32  ;;  %v110_v34 = vrot.slane %v3522_v31, %v3528_v22  ;;  %v486_v30 = vld [vmem:[#allocation7 + $0x568] sm:$0xf] }
  0x87   :  { %1086 = vmatpush1.bf16.msra.mxu0 %v2801_v40  ;;  %3028 = vmatprep.subr.bf16.mxu1 %v2809_v50  ;;  %v117_v40 = vsub.s32 3, %v3520_v28  ;;  %v530_v0 = vld [vmem:[#allocation7 + $0x828] sm:$0xf] }
  0x88   :  { %1087 = vmatprep.subr.bf16.mxu0 %v2805_v41 }
  0x89   :  { %v118_v44 = vrot.slane %v3522_v31, %v117_v40 }
  0x8a   :  { %3029 = vmatpush3.bf16.msra.mxu1 %v2785_v52  ;;  %v474_v52 = vld [vmem:[#allocation7 + $0x4a8] sm:$0xf] }
  0x8b   :  { %1088 = vmatpush1.bf16.msra.mxu0 %v2804_v42  ;;  %3030 = vmatprep.subr.bf16.mxu1 %v2812_v60  ;;  %v2823_v60 = vcombine.high %v475_v53, %v477_v54 }
  0x8c   :  { %1089 = vmatprep.subr.bf16.mxu0 %v2808_v46 }
  0x8e   :  { %3031 = vmatpush3.bf16.msra.mxu1 %v2788_v62  ;;  %v476_v62 = vld [vmem:[#allocation7 + $0x4c8] sm:$0xf] }
  0x8f   :  { %1090 = vmatpush1.bf16.msra.mxu0 %v2807_v51  ;;  %3032 = vmatprep.subr.bf16.mxu1 %v2815_v8  ;;  %v472_v51 = vld [vmem:[#allocation7 + $0x488] sm:$0xf]  ;;  %v2824_v10 = vcombine.low %v476_v62, %v478_v63  ;;  %v497_v62 = vld [vmem:[#allocation7 + $0x620] sm:$0xff] }
  0x90   :  { %1091 = vmatprep.subr.bf16.mxu0 %v2811_v56  ;;  %v510_v56 = vld [vmem:[#allocation7 + $0x6e8] sm:$0xf]  ;;  %v2821_v57 = vcombine.low %v472_v51, %v474_v52 }
  0x91   :  { %v528_v63 = vld [vmem:[#allocation7 + $0x808] sm:$0xf] }
  0x92   :  { %3033 = vmatpush3.bf16.msra.mxu1 %v2791_v9  ;;  %v2822_v9 = vcombine.low %v475_v53, %v477_v54 }
  0x93   :  { %1092 = vmatpush1.bf16.msra.mxu0 %v2810_v61  ;;  %3034 = vmatprep.subr.bf16.mxu1 %v2818_v16  ;;  %v2848_v61 = vcombine.low %v508_v55, %v510_v56  ;;  %v485_v16 = vld [vmem:[#allocation7 + $0x560] sm:$0xff] }
  0x94   :  { %1093 = vmatprep.subr.bf16.mxu0 %v2814_v2  ;;  %v2829_v24 = vcombine.high %v483_v15, %v485_v16 }
  0x96   :  { %3035 = vmatpush3.bf16.msra.mxu1 %v2794_v18  ;;  %v518_v18 = vld [vmem:[#allocation7 + $0x768] sm:$0xf] }
  0x97   :  { %1094 = vmatpush1.bf16.msra.mxu0 %v2813_v4  ;;  %3042 = vmatprep.subr.bf16.mxu1 %v2845_v26  ;;  %v512_v4 = vld [vmem:[#allocation7 + $0x708] sm:$0xf]  ;;  %v114_v26 = vrot.slane %v3522_v31, %v3543_v6 }
  0x98   :  { %1095 = vmatprep.subr.bf16.mxu0 %v2817_v13  ;;  %v2851_v12 = vcombine.low %v512_v4, %v514_v5  ;;  %v480_v13 = vld [vmem:[#allocation7 + $0x508] sm:$0xf] }
  0x99   :  { %v2827_v20 = vcombine.low %v480_v13, %v482_v14  ;;  %v534_v13 = vld [vmem:[#allocation7 + $0x868] sm:$0xf] }
  0x9b   :  { %1096 = vmatpush1.bf16.msra.mxu0 %v2816_v17  ;;  %v516_v17 = vld [vmem:[#allocation7 + $0x748] sm:$0xf] }
  0x9c   :  { %1106 = vmatprep.subr.bf16.mxu0 %v2820_v23 }
 0x134   :  { %v261_v35 = vpop.f32.mrb[0].mxu1 }
 0x135   :  { %v262_v36 = vadd.f32 %v261_v35, %v106_v33  ;;  %v263_v37 = vpop.f32.mrb[1].mxu1  ;;  %v487_v33 = vld [vmem:[#allocation7 + $0x580] sm:$0xff]  ;;  %v520_v35 = vld [vmem:[#allocation7 + $0x788] sm:$0xf] }
 0x136   :  { %v264_v38 = vadd.f32 %v263_v37, %v110_v34  ;;  %v265_v39 = vpop.f32.mrb[2].mxu1  ;;  %v489_v34 = vld [vmem:[#allocation7 + $0x5a0] sm:$0xff]  ;;  %v2828_v37 = vcombine.low %v483_v15, %v485_v16 }
 0x137   :  { %v391_v41 = vpack.c.bf16 %v262_v36, %v262_v36  ;;  %v266_v42 = vpop.f32.mrb[3].mxu1  ;;  %v522_v36 = vld [vmem:[#allocation7 + $0x7a8] sm:$0xf]  ;;  %v126_v39 = vrot.slane %v3522_v31, %v125_v21  ;;  %v2831_v51 = vcombine.low %v487_v33, %v489_v34  ;;  %v505_v21 = vld [vmem:[#allocation7 + $0x6a0] sm:$0xff] }
 0x138   :  { %v392_v43 = vpack.c.bf16 %v264_v38, %v264_v38  ;;  %v2830_v38 = vcombine.low %v484_v29, %v486_v30  ;;  %v2857_v42 = vcombine.low %v520_v35, %v522_v36  ;;  %v507_v30 = vld [vmem:[#allocation7 + $0x6c0] sm:$0xff]  ;;  %v1237_v35 = vld [vmem:[#allocation7 + $0xcc] sm:$0xff] }
 0x139   :  { %v1239_v36 = vld [vmem:[#allocation7 + $0xec] sm:$0xff] }
 0x13a   :  { %3261 = vtanh.bf16 %v392_v43  ;;  %v488_v43 = vld [vmem:[#allocation7 + $0x588] sm:$0xf] }
 0x13b   :  { %3263 = vtanh.bf16 %v391_v41  ;;  %v2832_v41 = vcombine.high %v487_v33, %v489_v34  ;;  %v509_v34 = vld [vmem:[#allocation7 + $0x6e0] sm:$0xff] }
 0x13c   :  { %v3536_v45 = vpop.f32.mrb[4].mxu1 }
 0x13d   :  { %v304_v46 = vpop.f32.mrb[5].mxu1  ;;  %v303_v40 = vadd.f32 %v3536_v45, %v114_v26 }
 0x13e   :  { %v305_v47 = vadd.f32 %v304_v46, %v118_v44  ;;  %v306_v48 = vpop.f32.mrb[6].mxu1  ;;  %v490_v44 = vld [vmem:[#allocation7 + $0x5a8] sm:$0xf]  ;;  %v491_v46 = vld [vmem:[#allocation7 + $0x5c0] sm:$0xff] }
 0x13f   :  { %v307_v49 = vpop.f32.mrb[7].mxu1  ;;  %v524_v48 = vld [vmem:[#allocation7 + $0x7c8] sm:$0xf]  ;;  %v2833_v52 = vcombine.low %v488_v43, %v490_v44  ;;  %v393_v55 = vpack.c.bf16 %v303_v40, %v303_v40  ;;  %v2847_v40 = vcombine.high %v507_v30, %v509_v34  ;;  %v513_v43 = vld [vmem:[#allocation7 + $0x720] sm:$0xff]  ;;  %v1241_v44 = vld [vmem:[#allocation7 + $0x10c] sm:$0xff] }
 0x140   :  { %v394_v50 = vpack.c.bf16 %v305_v47, %v305_v47  ;;  %v493_v47 = vld [vmem:[#allocation7 + $0x5e0] sm:$0xff]  ;;  %v526_v49 = vld [vmem:[#allocation7 + $0x7e8] sm:$0xf] }
 0x141   :  { %v2835_v45 = vcombine.high %v491_v46, %v493_v47  ;;  %v2860_v56 = vcombine.low %v524_v48, %v526_v49  ;;  %v2834_v3 = vcombine.low %v491_v46, %v493_v47  ;;  %v1243_v46 = vld [vmem:[#allocation7 + $0x12c] sm:$0xff]  ;;  %v2846_v48 = vcombine.low %v507_v30, %v509_v34 }
 0x142   :  { %3265 = vtanh.bf16 %v394_v50  ;;  %v2870_v49 = vcombine.low %v1237_v35, %v1239_v36 }
 0x143   :  { %3267 = vtanh.bf16 %v393_v55  ;;  %v517_v55 = vld [vmem:[#allocation7 + $0x760] sm:$0xff] }
 0x144   :  { %v3538_v58 = vpop.f32.mrb[8].mxu1 }
 0x145   :  { %v3262_v59 = vpop.eup %3261  ;;  %v3540_v1 = vpop.f32.mrb[9].mxu1 }
 0x146   :  { %v3264_v2 = vpop.eup %3263  ;;  %1097 = vmatprep.mubr.bf16.mxu0 %v3262_v59  ;;  %1179 = vmatprep.mubr.bf16.mxu1 %v3262_v59  ;;  %v347_v7 = vpop.f32.mrb[10].mxu1  ;;  %v346_v53 = vadd.f32 %v3540_v1, %v126_v39  ;;  %v494_v59 = vld [vmem:[#allocation7 + $0x5e8] sm:$0xf] }
 0x147   :  { %1098 = vmatmul.mubr.bf16.vlgmr.msra.gmra.mrb[0].mxu0 %v3264_v2  ;;  %1180 = vmatmul.mubr.bf16.vlgmr.msra.gmra.mrb[16].mxu1 %v3264_v2  ;;  %v348_v8 = vpop.f32.mrb[11].mxu1  ;;  %v2863_v7 = vcombine.low %v528_v63, %v530_v0  ;;  %v521_v63 = vld [vmem:[#allocation7 + $0x7a0] sm:$0xff]  ;;  %v1249_v0 = vld [vmem:[#allocation7 + $0x18c] sm:$0xff] }
 0x148   :  { %1107 = vmatpush1.bf16.msra.mxu0 %v2819_v25  ;;  %3043 = vmatpush3.bf16.msra.mxu1 %v2821_v57  ;;  %v2854_v25 = vcombine.low %v516_v17, %v518_v18  ;;  %v492_v57 = vld [vmem:[#allocation7 + $0x5c8] sm:$0xf]  ;;  %v396_v1 = vpack.c.bf16 %v346_v53, %v346_v53  ;;  %v2874_v53 = vcombine.high %v1241_v44, %v1243_v46 }
 0x149   :  { %1108 = vmatprep.subr.bf16.mxu0 %v2823_v60  ;;  %3044 = vmatprep.subr.bf16.mxu1 %v2848_v61  ;;  %v495_v60 = vld [vmem:[#allocation7 + $0x600] sm:$0xff]  ;;  %v2836_v4 = vcombine.low %v492_v57, %v494_v59  ;;  %v496_v8 = vld [vmem:[#allocation7 + $0x608] sm:$0xf]  ;;  %v2873_v59 = vcombine.low %v1241_v44, %v1243_v46  ;;  %v1269_v44 = vld [vmem:[#allocation7 + $0x2cc] sm:$0xff] }
 0x14a   :  { %v2838_v5 = vcombine.high %v495_v60, %v497_v62  ;;  %v2837_v14 = vcombine.low %v495_v60, %v497_v62  ;;  %3269 = vtanh.bf16 %v396_v1  ;;  %v500_v18 = vld [vmem:[#allocation7 + $0x648] sm:$0xf] }
 0x14c   :  { %1109 = vmatpush1.bf16.msra.mxu0 %v2822_v9  ;;  %3045 = vmatpush3.bf16.msra.mxu1 %v2824_v10  ;;  %v3550_v50 = vpop.f32.mrb[12].mxu1  ;;  %v498_v9 = vld [vmem:[#allocation7 + $0x628] sm:$0xf]  ;;  %v499_v10 = vld [vmem:[#allocation7 + $0x640] sm:$0xff] }
 0x14d   :  { %v3266_v23 = vpop.eup %3265  ;;  %1110 = vmatprep.subr.bf16.mxu0 %v2826_v11  ;;  %3046 = vmatprep.subr.bf16.mxu1 %v2851_v12  ;;  %v3553_v54 = vpop.f32.mrb[13].mxu1  ;;  %v501_v11 = vld [vmem:[#allocation7 + $0x660] sm:$0xff]  ;;  %v532_v12 = vld [vmem:[#allocation7 + $0x848] sm:$0xf]  ;;  %v2839_v15 = vcombine.low %v496_v8, %v498_v9  ;;  %v1253_v9 = vld [vmem:[#allocation7 + $0x1cc] sm:$0xff] }
 0x14e   :  { %1219 = vmatprep.mubr.bf16.mxu1 %v3266_v23  ;;  %1138 = vmatprep.mubr.bf16.mxu0 %v3266_v23  ;;  %v388_v61 = vpop.f32.mrb[14].mxu1  ;;  %v2841_v16 = vcombine.high %v499_v10, %v501_v11  ;;  %v2866_v17 = vcombine.low %v532_v12, %v534_v13  ;;  %v1233_v23 = vld [vmem:[#allocation7 + $0x8c] sm:$0xff]  ;;  %v525_v8 = vld [vmem:[#allocation7 + $0x7e0] sm:$0xff] }
 0x14f   :  { %v389_v2 = vpop.f32.mrb[15].mxu1  ;;  %v519_v61 = vld [vmem:[#allocation7 + $0x780] sm:$0xff] }
 0x150   :  { %1111 = vmatpush1.bf16.msra.mxu0 %v2825_v19  ;;  %3047 = vmatpush3.bf16.msra.mxu1 %v2827_v20  ;;  %v502_v19 = vld [vmem:[#allocation7 + $0x668] sm:$0xf]  ;;  %v503_v20 = vld [vmem:[#allocation7 + $0x680] sm:$0xff]  ;;  %v1251_v2 = vld [vmem:[#allocation7 + $0x1ac] sm:$0xff]  ;;  %v2856_v1 = vcombine.high %v519_v61, %v521_v63 }
 0x151   :  { %1112 = vmatprep.subr.bf16.mxu0 %v2829_v24  ;;  %3048 = vmatprep.subr.bf16.mxu1 %v2854_v25  ;;  %v1235_v24 = vld [vmem:[#allocation7 + $0xac] sm:$0xff]  ;;  %v2840_v25 = vcombine.low %v499_v10, %v501_v11  ;;  %v2842_v26 = vcombine.low %v500_v18, %v502_v19  ;;  %v2844_v29 = vcombine.high %v503_v20, %v505_v21 }
 0x152   :  { %v2868_v33 = vcombine.high %v1233_v23, %v1235_v24  ;;  %v2867_v39 = vcombine.low %v1233_v23, %v1235_v24  ;;  %v1255_v10 = vld [vmem:[#allocation7 + $0x1ec] sm:$0xff]  ;;  %v2855_v11 = vcombine.low %v519_v61, %v521_v63  ;;  %v2879_v12 = vcombine.low %v1249_v0, %v1251_v2  ;;  %v531_v23 = vld [vmem:[#allocation7 + $0x840] sm:$0xff]  ;;  %v1240_v61 = vld [vmem:[#allocation7 + $0xf4] sm:$0xf] }
 0x153   :  { %v1259_v18 = vld [vmem:[#allocation7 + $0x22c] sm:$0xff]  ;;  %v1274_v63 = vld [vmem:[#allocation7 + $0x314] sm:$0xf] }
 0x154   :  { %1113 = vmatpush1.bf16.msra.mxu0 %v2828_v37  ;;  %3049 = vmatpush3.bf16.msra.mxu1 %v2830_v38  ;;  %v3555_v37 = vpop.eup %3267  ;;  %v2843_v38 = vcombine.low %v503_v20, %v505_v21  ;;  %v2882_v20 = vcombine.low %v1253_v9, %v1255_v10 }
 0x155   :  { %1114 = vmatprep.subr.bf16.mxu0 %v2832_v41  ;;  %3050 = vmatprep.subr.bf16.mxu1 %v2857_v42  ;;  %v511_v41 = vld [vmem:[#allocation7 + $0x700] sm:$0xff]  ;;  %v2871_v42 = vcombine.high %v1237_v35, %v1239_v36  ;;  %v3557_v47 = vpop.eup %3269  ;;  %v1265_v36 = vld [vmem:[#allocation7 + $0x28c] sm:$0xff] }
 0x156   :  { %v2849_v57 = vcombine.low %v511_v41, %v513_v43 }
 0x158   :  { %1115 = vmatpush1.bf16.msra.mxu0 %v2831_v51  ;;  %3051 = vmatpush3.bf16.msra.mxu1 %v2833_v52  ;;  %v2850_v51 = vcombine.high %v511_v41, %v513_v43  ;;  %v515_v52 = vld [vmem:[#allocation7 + $0x740] sm:$0xff] }
 0x159   :  { %1116 = vmatprep.subr.bf16.mxu0 %v2835_v45  ;;  %3052 = vmatprep.subr.bf16.mxu1 %v2860_v56  ;;  %v1245_v45 = vld [vmem:[#allocation7 + $0x14c] sm:$0xff]  ;;  %v2853_v60 = vcombine.high %v515_v52, %v517_v55 }
 0x15a   :  { %v1247_v56 = vld [vmem:[#allocation7 + $0x16c] sm:$0xff] }
 0x15b   :  { %v2877_v62 = vcombine.high %v1245_v45, %v1247_v56 }
 0x15c   :  { %1117 = vmatpush1.bf16.msra.mxu0 %v2834_v3  ;;  %3053 = vmatpush3.bf16.msra.mxu1 %v2836_v4  ;;  %v2852_v3 = vcombine.low %v515_v52, %v517_v55  ;;  %v2876_v4 = vcombine.low %v1245_v45, %v1247_v56  ;;  %v1270_v52 = vld [vmem:[#allocation7 + $0x2d4] sm:$0xf] }
 0x15d   :  { %1118 = vmatprep.subr.bf16.mxu0 %v2838_v5  ;;  %3054 = vmatprep.subr.bf16.mxu1 %v2863_v7  ;;  %v523_v5 = vld [vmem:[#allocation7 + $0x7c0] sm:$0xff]  ;;  %v2880_v7 = vcombine.high %v1249_v0, %v1251_v2  ;;  %v1276_v0 = vld [vmem:[#allocation7 + $0x334] sm:$0xf] }
 0x15e   :  { %v2859_v13 = vcombine.high %v523_v5, %v525_v8  ;;  %v2858_v19 = vcombine.low %v523_v5, %v525_v8  ;;  %v121_v5 = vsub.s32 4, %v3520_v28  ;;  %v1242_v8 = vld [vmem:[#allocation7 + $0x114] sm:$0xf] }
 0x160   :  { %1119 = vmatpush1.bf16.msra.mxu0 %v2837_v14  ;;  %3055 = vmatpush3.bf16.msra.mxu1 %v2839_v15  ;;  %v527_v14 = vld [vmem:[#allocation7 + $0x800] sm:$0xff]  ;;  %v2883_v15 = vcombine.high %v1253_v9, %v1255_v10  ;;  %v1244_v9 = vld [vmem:[#allocation7 + $0x134] sm:$0xf]  ;;  %v1279_v10 = vld [vmem:[#allocation7 + $0x36c] sm:$0xff] }
 0x161   :  { %1120 = vmatprep.subr.bf16.mxu0 %v2841_v16  ;;  %3056 = vmatprep.subr.bf16.mxu1 %v2866_v17  ;;  %v529_v16 = vld [vmem:[#allocation7 + $0x820] sm:$0xff]  ;;  %v1257_v17 = vld [vmem:[#allocation7 + $0x20c] sm:$0xff] }
 0x162   :  { %v2862_v21 = vcombine.high %v527_v14, %v529_v16  ;;  %v2886_v24 = vcombine.high %v1257_v17, %v1259_v18  ;;  %v2861_v30 = vcombine.low %v527_v14, %v529_v16  ;;  %v133_v14 = vsub.s32 7, %v3520_v28 }
 0x163   :  { %v122_v16 = vrot.slane %v3522_v31, %v121_v5  ;;  %v1297_v5 = vld [vmem:[#allocation7 + $0x48c] sm:$0xff] }
 0x164   :  { %1121 = vmatpush1.bf16.msra.mxu0 %v2840_v25  ;;  %3057 = vmatpush3.bf16.msra.mxu1 %v2842_v26  ;;  %v533_v25 = vld [vmem:[#allocation7 + $0x860] sm:$0xff]  ;;  %v1261_v26 = vld [vmem:[#allocation7 + $0x24c] sm:$0xff] }
 0x165   :  { %1122 = vmatprep.subr.bf16.mxu0 %v2844_v29  ;;  %1891 = vmatprep.subr.bf16.mxu1 %v2868_v33  ;;  %v1263_v29 = vld [vmem:[#allocation7 + $0x26c] sm:$0xff]  ;;  %v2885_v33 = vcombine.low %v1257_v17, %v1259_v18  ;;  %v2865_v34 = vcombine.high %v531_v23, %v533_v25  ;;  %v2864_v41 = vcombine.low %v531_v23, %v533_v25  ;;  %v1282_v23 = vld [vmem:[#allocation7 + $0x394] sm:$0xf] }
 0x166   :  { %v2889_v35 = vcombine.high %v1261_v26, %v1263_v29  ;;  %v1281_v17 = vld [vmem:[#allocation7 + $0x38c] sm:$0xff] }
 0x167   :  { %1220 = vmatmul.mubr.bf16.vlgmr.msra.gmra.mrb[20].mxu1 %v3555_v37 }
 0x168   :  { %1123 = vmatpush1.bf16.msra.mxu0 %v2843_v38  ;;  %1892 = vmatpush1.bf16.msra.mxu1 %v2867_v39  ;;  %v1267_v38 = vld [vmem:[#allocation7 + $0x2ac] sm:$0xff]  ;;  %v1266_v39 = vld [vmem:[#allocation7 + $0x294] sm:$0xf] }
 0x169   :  { %1124 = vmatprep.subr.bf16.mxu0 %v2847_v40  ;;  %1893 = vmatprep.subr.bf16.mxu1 %v2871_v42  ;;  %v1268_v40 = vld [vmem:[#allocation7 + $0x2b4] sm:$0xf]  ;;  %v2888_v42 = vcombine.low %v1261_v26, %v1263_v29  ;;  %v2892_v43 = vcombine.high %v1265_v36, %v1267_v38  ;;  %v2891_v55 = vcombine.low %v1265_v36, %v1267_v38  ;;  %v1287_v38 = vld [vmem:[#allocation7 + $0x3ec] sm:$0xff] }
 0x16a   :  { %1923 = vmatprep.mubr.bf16.mxu1 %v3557_v47  ;;  %v2893_v46 = vcombine.low %v1266_v39, %v1268_v40  ;;  %v134_v26 = vrot.slane %v3522_v31, %v133_v14  ;;  %v344_v29 = vadd.f32 %v3538_v58, %v122_v16  ;;  %v1252_v36 = vld [vmem:[#allocation7 + $0x1b4] sm:$0xf] }
 0x16b   :  { %v1286_v39 = vld [vmem:[#allocation7 + $0x3d4] sm:$0xf] }
 0x16c   :  { %1125 = vmatpush1.bf16.msra.mxu0 %v2846_v48  ;;  %1894 = vmatpush1.bf16.msra.mxu1 %v2870_v49  ;;  %v1234_v48 = vld [vmem:[#allocation7 + $0x94] sm:$0xf] }
 0x16d   :  { %1126 = vmatprep.subr.bf16.mxu0 %v2850_v51  ;;  %1895 = vmatprep.subr.bf16.mxu1 %v2874_v53  ;;  %v1236_v49 = vld [vmem:[#allocation7 + $0xb4] sm:$0xf]  ;;  %v1271_v51 = vld [vmem:[#allocation7 + $0x2ec] sm:$0xff] }
 0x16e   :  { %v1272_v53 = vld [vmem:[#allocation7 + $0x2f4] sm:$0xf]  ;;  %v2869_v45 = vcombine.low %v1234_v48, %v1236_v49  ;;  %v2895_v56 = vcombine.high %v1269_v44, %v1271_v51  ;;  %v2894_v2 = vcombine.low %v1269_v44, %v1271_v51  ;;  %v395_v44 = vpack.c.bf16 %v344_v29, %v344_v29  ;;  %v1289_v48 = vld [vmem:[#allocation7 + $0x40c] sm:$0xff] }
 0x16f   :  { %v1288_v40 = vld [vmem:[#allocation7 + $0x3f4] sm:$0xf] }
 0x170   :  { %1127 = vmatpush1.bf16.msra.mxu0 %v2849_v57  ;;  %1896 = vmatpush1.bf16.msra.mxu1 %v2873_v59  ;;  %v1273_v57 = vld [vmem:[#allocation7 + $0x30c] sm:$0xff]  ;;  %v2896_v59 = vcombine.low %v1270_v52, %v1272_v53  ;;  %v2908_v58 = vcombine.low %v1286_v39, %v1288_v40  ;;  %v1254_v49 = vld [vmem:[#allocation7 + $0x1d4] sm:$0xf]  ;;  %3271 = vtanh.bf16 %v395_v44 }
 0x171   :  { %1128 = vmatprep.subr.bf16.mxu0 %v2853_v60  ;;  %1897 = vmatprep.subr.bf16.mxu1 %v2877_v62  ;;  %v1238_v60 = vld [vmem:[#allocation7 + $0xd4] sm:$0xf]  ;;  %v1275_v62 = vld [vmem:[#allocation7 + $0x32c] sm:$0xff] }
 0x172   :  { %v1256_v51 = vld [vmem:[#allocation7 + $0x1f4] sm:$0xf]  ;;  %v1291_v52 = vld [vmem:[#allocation7 + $0x42c] sm:$0xff] }
 0x173   :  { %v1290_v53 = vld [vmem:[#allocation7 + $0x414] sm:$0xf] }
 0x174   :  { %1129 = vmatpush1.bf16.msra.mxu0 %v2852_v3  ;;  %1898 = vmatpush1.bf16.msra.mxu1 %v2876_v4  ;;  %v2872_v3 = vcombine.low %v1238_v60, %v1240_v61  ;;  %v2898_v4 = vcombine.high %v1273_v57, %v1275_v62  ;;  %v1258_v61 = vld [vmem:[#allocation7 + $0x214] sm:$0xf] }
 0x175   :  { %1130 = vmatprep.subr.bf16.mxu0 %v2856_v1  ;;  %1899 = vmatprep.subr.bf16.mxu1 %v2880_v7  ;;  %v1277_v1 = vld [vmem:[#allocation7 + $0x34c] sm:$0xff]  ;;  %v2899_v7 = vcombine.low %v1274_v63, %v1276_v0  ;;  %v1294_v0 = vld [vmem:[#allocation7 + $0x454] sm:$0xf] }
 0x176   :  { %v1295_v63 = vld [vmem:[#allocation7 + $0x46c] sm:$0xff]  ;;  %v1306_v44 = vld [vmem:[#allocation7 + $0x514] sm:$0xf] }
 0x178   :  { %1131 = vmatpush1.bf16.msra.mxu0 %v2855_v11  ;;  %1900 = vmatpush1.bf16.msra.mxu1 %v2879_v12  ;;  %v1278_v11 = vld [vmem:[#allocation7 + $0x354] sm:$0xf] }
 0x179   :  { %1132 = vmatprep.subr.bf16.mxu0 %v2859_v13  ;;  %1901 = vmatprep.subr.bf16.mxu1 %v2883_v15  ;;  %v1280_v12 = vld [vmem:[#allocation7 + $0x374] sm:$0xf]  ;;  %v2875_v13 = vcombine.low %v1242_v8, %v1244_v9  ;;  %v2901_v15 = vcombine.high %v1277_v1, %v1279_v10 }
 0x17a   :  { %v2902_v18 = vcombine.low %v1278_v11, %v1280_v12  ;;  %v1262_v8 = vld [vmem:[#allocation7 + $0x254] sm:$0xf] }
 0x17b   :  { %v1264_v9 = vld [vmem:[#allocation7 + $0x274] sm:$0xf] }
 0x17c   :  { %1133 = vmatpush1.bf16.msra.mxu0 %v2858_v19  ;;  %1902 = vmatpush1.bf16.msra.mxu1 %v2882_v20  ;;  %v1246_v19 = vld [vmem:[#allocation7 + $0x154] sm:$0xf] }
 0x17d   :  { %1134 = vmatprep.subr.bf16.mxu0 %v2862_v21  ;;  %1903 = vmatprep.subr.bf16.mxu1 %v2886_v24  ;;  %v1248_v20 = vld [vmem:[#allocation7 + $0x174] sm:$0xf]  ;;  %v1283_v21 = vld [vmem:[#allocation7 + $0x3ac] sm:$0xff] }
 0x17e   :  { %v1284_v24 = vld [vmem:[#allocation7 + $0x3b4] sm:$0xf]  ;;  %v2878_v25 = vcombine.low %v1246_v19, %v1248_v20  ;;  %v1303_v19 = vld [vmem:[#allocation7 + $0x4ec] sm:$0xff] }
 0x17f   :  { %v1330_v11 = vld [vmem:[#allocation7 + $0x694] sm:$0xf] }
 0x180   :  { %1135 = vmatpush1.bf16.msra.mxu0 %v2861_v30  ;;  %1904 = vmatpush1.bf16.msra.mxu1 %v2885_v33  ;;  %v2904_v30 = vcombine.high %v1281_v17, %v1283_v21  ;;  %v1285_v33 = vld [vmem:[#allocation7 + $0x3cc] sm:$0xff]  ;;  %v1332_v12 = vld [vmem:[#allocation7 + $0x6b4] sm:$0xf] }
 0x181   :  { %1136 = vmatprep.subr.bf16.mxu0 %v2865_v34  ;;  %1905 = vmatprep.subr.bf16.mxu1 %v2889_v35  ;;  %v2905_v34 = vcombine.low %v1282_v23, %v1284_v24  ;;  %v1250_v35 = vld [vmem:[#allocation7 + $0x194] sm:$0xf]  ;;  %v2941_v16 = vcombine.low %v1330_v11, %v1332_v12  ;;  %v3272_v23 = vpop.eup %3271  ;;  %v1321_v12 = vld [vmem:[#allocation7 + $0x60c] sm:$0xff] }
 0x182   :  { %v1334_v20 = vld [vmem:[#allocation7 + $0x6d4] sm:$0xf] }
 0x184   :  { %1137 = vmatpush1.bf16.msra.mxu0 %v2864_v41  ;;  %1906 = vmatpush1.bf16.msra.mxu1 %v2888_v42  ;;  %v2903_v41 = vcombine.low %v1281_v17, %v1283_v21  ;;  %v2881_v42 = vcombine.low %v1250_v35, %v1252_v36  ;;  %v1298_v17 = vld [vmem:[#allocation7 + $0x494] sm:$0xf] }
 0x185   :  { %1907 = vmatprep.subr.bf16.mxu1 %v2892_v43  ;;  %3064 = vmatprep.subr.bf16.mxu0 %v2893_v46  ;;  %v387_v43 = vadd.f32 %v3553_v54, %v134_v26  ;;  %v2907_v46 = vcombine.high %v1285_v33, %v1287_v38  ;;  %v1293_v54 = vld [vmem:[#allocation7 + $0x44c] sm:$0xff]  ;;  %v1336_v21 = vld [vmem:[#allocation7 + $0x6f4] sm:$0xf] }
 0x186   :  { %v1305_v26 = vld [vmem:[#allocation7 + $0x50c] sm:$0xff]  ;;  %v2944_v29 = vcombine.low %v1334_v20, %v1336_v21  ;;  %v1338_v35 = vld [vmem:[#allocation7 + $0x714] sm:$0xf] }
 0x187   :  { %1139 = vmatmul.mubr.bf16.vlgmr.msra.gmra.mrb[0].mxu0 %v3555_v37  ;;  %v2897_v37 = vcombine.low %v1273_v57, %v1275_v62  ;;  %v398_v57 = vpack.c.bf16 %v387_v43, %v387_v43  ;;  %v1260_v62 = vld [vmem:[#allocation7 + $0x234] sm:$0xf]  ;;  %v1325_v21 = vld [vmem:[#allocation7 + $0x64c] sm:$0xff] }
 0x188   :  { %1908 = vmatpush1.bf16.msra.mxu1 %v2891_v55  ;;  %3065 = vmatpush3.bf16.msra.mxu0 %v2869_v45  ;;  %v1292_v55 = vld [vmem:[#allocation7 + $0x434] sm:$0xf]  ;;  %v2906_v45 = vcombine.low %v1285_v33, %v1287_v38 }
 0x189   :  { %1909 = vmatprep.subr.bf16.mxu1 %v2895_v56  ;;  %3066 = vmatprep.subr.bf16.mxu0 %v2896_v59  ;;  %v2884_v56 = vcombine.low %v1254_v49, %v1256_v51  ;;  %v2910_v59 = vcombine.high %v1289_v48, %v1291_v52  ;;  %v2911_v60 = vcombine.low %v1290_v53, %v1292_v55  ;;  %3273 = vtanh.bf16 %v398_v57  ;;  %v1304_v33 = vld [vmem:[#allocation7 + $0x4f4] sm:$0xf] }
 0x18a   :  { %2005 = vmatprep.mubr.bf16.mxu0 %v3557_v47  ;;  %v2900_v47 = vcombine.low %v1277_v1, %v1279_v10  ;;  %v2913_v1 = vcombine.high %v1293_v54, %v1295_v63  ;;  %v1299_v10 = vld [vmem:[#allocation7 + $0x4ac] sm:$0xff]  ;;  %v1340_v36 = vld [vmem:[#allocation7 + $0x734] sm:$0xf]  ;;  %v129_v51 = vsub.s32 6, %v3520_v28 }
 0x18b   :  { %v2916_v14 = vcombine.high %v1297_v5, %v1299_v10  ;;  %v2915_v24 = vcombine.low %v1297_v5, %v1299_v10  ;;  %v2947_v43 = vcombine.low %v1338_v35, %v1340_v36  ;;  %v1344_v49 = vld [vmem:[#allocation7 + $0x774] sm:$0xf]  ;;  %v1319_v5 = vld [vmem:[#allocation7 + $0x5ec] sm:$0xff] }
 0x18c   :  { %1910 = vmatpush1.bf16.msra.mxu1 %v2894_v2  ;;  %3067 = vmatpush3.bf16.msra.mxu0 %v2872_v3  ;;  %v1296_v2 = vld [vmem:[#allocation7 + $0x474] sm:$0xf]  ;;  %v2909_v3 = vcombine.low %v1289_v48, %v1291_v52  ;;  %v1311_v48 = vld [vmem:[#allocation7 + $0x56c] sm:$0xff] }
 0x18d   :  { %1911 = vmatprep.subr.bf16.mxu1 %v2898_v4  ;;  %3068 = vmatprep.subr.bf16.mxu0 %v2899_v7  ;;  %v2887_v4 = vcombine.low %v1258_v61, %v1260_v62  ;;  %v2914_v7 = vcombine.low %v1294_v0, %v1296_v2  ;;  %v1310_v57 = vld [vmem:[#allocation7 + $0x554] sm:$0xf]  ;;  %v130_v62 = vrot.slane %v3522_v31, %v129_v51  ;;  %v1317_v2 = vld [vmem:[#allocation7 + $0x5cc] sm:$0xff] }
 0x18e   :  { %v1348_v61 = vld [vmem:[#allocation7 + $0x7b4] sm:$0xf]  ;;  %v2931_v11 = vcombine.high %v1317_v2, %v1319_v5 }
 0x18f   :  { %v1326_v36 = vld [vmem:[#allocation7 + $0x654] sm:$0xf] }
 0x190   :  { %1912 = vmatpush1.bf16.msra.mxu1 %v2897_v37  ;;  %3069 = vmatpush3.bf16.msra.mxu0 %v2875_v13  ;;  %v2912_v37 = vcombine.low %v1293_v54, %v1295_v63  ;;  %v2890_v13 = vcombine.low %v1262_v8, %v1264_v9  ;;  %v1315_v54 = vld [vmem:[#allocation7 + $0x5ac] sm:$0xff]  ;;  %v1352_v8 = vld [vmem:[#allocation7 + $0x7f4] sm:$0xf]  ;;  %v385_v9 = vadd.f32 %v3550_v50, %v130_v62 }
 0x191   :  { %1913 = vmatprep.subr.bf16.mxu1 %v2901_v15  ;;  %3070 = vmatprep.subr.bf16.mxu0 %v2902_v18  ;;  %v1301_v15 = vld [vmem:[#allocation7 + $0x4cc] sm:$0xff]  ;;  %v1300_v18 = vld [vmem:[#allocation7 + $0x4b4] sm:$0xf] }
 0x192   :  { %v2918_v39 = vcombine.low %v1301_v15, %v1303_v19  ;;  %v1343_v62 = vld [vmem:[#allocation7 + $0x76c] sm:$0xff] }
 0x194   :  { %1914 = vmatpush1.bf16.msra.mxu1 %v2900_v47  ;;  %3071 = vmatpush3.bf16.msra.mxu0 %v2878_v25  ;;  %v2917_v47 = vcombine.low %v1298_v17, %v1300_v18  ;;  %v2919_v25 = vcombine.high %v1301_v15, %v1303_v19  ;;  %v3274_v38 = vpop.eup %3273  ;;  %v1323_v15 = vld [vmem:[#allocation7 + $0x62c] sm:$0xff]  ;;  %v1356_v17 = vld [vmem:[#allocation7 + $0x834] sm:$0xf]  ;;  %v397_v18 = vpack.c.bf16 %v385_v9, %v385_v9  ;;  %v2080_v9 = vld [vmem:[#allocation7 + $0x338] sm:$0xf] }
 0x195   :  { %1915 = vmatprep.subr.bf16.mxu1 %v2904_v30  ;;  %3072 = vmatprep.subr.bf16.mxu0 %v2905_v34  ;;  %v1302_v30 = vld [vmem:[#allocation7 + $0x4d4] sm:$0xf]  ;;  %v1307_v34 = vld [vmem:[#allocation7 + $0x52c] sm:$0xff]  ;;  %v2930_v19 = vcombine.low %v1317_v2, %v1319_v5  ;;  %v2934_v50 = vcombine.high %v1321_v12, %v1323_v15 }
 0x196   :  { %v2920_v40 = vcombine.low %v1302_v30, %v1304_v33  ;;  %v2921_v52 = vcombine.low %v1305_v26, %v1307_v34  ;;  %3275 = vtanh.bf16 %v397_v18  ;;  %v2933_v30 = vcombine.low %v1321_v12, %v1323_v15  ;;  %v1347_v2 = vld [vmem:[#allocation7 + $0x7ac] sm:$0xff]  ;;  %v2063_v12 = vld [vmem:[#allocation7 + $0x118] sm:$0xf] }
 0x197   :  { %v2082_v15 = vld [vmem:[#allocation7 + $0x378] sm:$0xf] }
 0x198   :  { %1916 = vmatpush1.bf16.msra.mxu1 %v2903_v41  ;;  %3073 = vmatpush3.bf16.msra.mxu0 %v2881_v42  ;;  %v2922_v41 = vcombine.high %v1305_v26, %v1307_v34  ;;  %v1309_v42 = vld [vmem:[#allocation7 + $0x54c] sm:$0xff]  ;;  %v1358_v26 = vld [vmem:[#allocation7 + $0x854] sm:$0xf] }
 0x199   :  { %1917 = vmatprep.subr.bf16.mxu1 %v2907_v46  ;;  %3074 = vmatprep.subr.bf16.mxu0 %v2908_v58  ;;  %v1308_v46 = vld [vmem:[#allocation7 + $0x534] sm:$0xf]  ;;  %v2925_v55 = vcombine.high %v1309_v42, %v1311_v48  ;;  %v2924_v63 = vcombine.low %v1309_v42, %v1311_v48  ;;  %v2075_v48 = vld [vmem:[#allocation7 + $0x298] sm:$0xf] }
 0x19a   :  { %v1342_v58 = vld [vmem:[#allocation7 + $0x754] sm:$0xf]  ;;  %v2923_v53 = vcombine.low %v1306_v44, %v1308_v46  ;;  %v1333_v44 = vld [vmem:[#allocation7 + $0x6cc] sm:$0xff] }
 0x19b   :  { %v1335_v46 = vld [vmem:[#allocation7 + $0x6ec] sm:$0xff] }
 0x19c   :  { %1918 = vmatpush1.bf16.msra.mxu1 %v2906_v45  ;;  %3075 = vmatpush3.bf16.msra.mxu0 %v2884_v56  ;;  %v1313_v45 = vld [vmem:[#allocation7 + $0x58c] sm:$0xff]  ;;  %v2950_v56 = vcombine.low %v1342_v58, %v1344_v49  ;;  %v2076_v58 = vld [vmem:[#allocation7 + $0x2b8] sm:$0xf] }
 0x19d   :  { %1919 = vmatprep.subr.bf16.mxu1 %v2910_v59  ;;  %3076 = vmatprep.subr.bf16.mxu0 %v2911_v60  ;;  %v1312_v59 = vld [vmem:[#allocation7 + $0x574] sm:$0xf]  ;;  %v2928_v0 = vcombine.high %v1313_v45, %v1315_v54  ;;  %v2927_v10 = vcombine.low %v1313_v45, %v1315_v54  ;;  %v2971_v51 = vcombine.low %v2075_v48, %v2076_v58  ;;  %v2092_v48 = vld [vmem:[#allocation7 + $0x4b8] sm:$0xf] }
 0x19e   :  { %v1346_v60 = vld [vmem:[#allocation7 + $0x794] sm:$0xf]  ;;  %v2926_v28 = vcombine.low %v1310_v57, %v1312_v59  ;;  %v1337_v57 = vld [vmem:[#allocation7 + $0x70c] sm:$0xff]  ;;  %v2942_v54 = vcombine.low %v1333_v44, %v1335_v46 }
 0x19f   :  { %v1339_v59 = vld [vmem:[#allocation7 + $0x72c] sm:$0xff] }
 0x1a0   :  { %1920 = vmatpush1.bf16.msra.mxu1 %v2909_v3  ;;  %3077 = vmatpush3.bf16.msra.mxu0 %v2887_v4  ;;  %v2953_v3 = vcombine.low %v1346_v60, %v1348_v61  ;;  %v1314_v4 = vld [vmem:[#allocation7 + $0x594] sm:$0xf]  ;;  %v2946_v60 = vcombine.high %v1337_v57, %v1339_v59  ;;  %v1341_v61 = vld [vmem:[#allocation7 + $0x74c] sm:$0xff] }
 0x1a1   :  { %1921 = vmatprep.subr.bf16.mxu1 %v2913_v1  ;;  %3078 = vmatprep.subr.bf16.mxu0 %v2914_v7  ;;  %v1316_v1 = vld [vmem:[#allocation7 + $0x5b4] sm:$0xf] }
 0x1a2   :  { %v1350_v7 = vld [vmem:[#allocation7 + $0x7d4] sm:$0xf]  ;;  %v2929_v31 = vcombine.low %v1314_v4, %v1316_v1  ;;  %v2078_v4 = vld [vmem:[#allocation7 + $0x2f8] sm:$0xf] }
 0x1a3   :  { %v2061_v1 = vld [vmem:[#allocation7 + $0xd8] sm:$0xf] }
 0x1a4   :  { %1922 = vmatpush1.bf16.msra.mxu1 %v2912_v37  ;;  %3079 = vmatpush3.bf16.msra.mxu0 %v2890_v13  ;;  %v2956_v37 = vcombine.low %v1350_v7, %v1352_v8  ;;  %v1318_v13 = vld [vmem:[#allocation7 + $0x5d4] sm:$0xf]  ;;  %v2062_v7 = vld [vmem:[#allocation7 + $0xf8] sm:$0xf] }
 0x1a5   :  { %1932 = vmatprep.subr.bf16.mxu1 %v2916_v14  ;;  %3086 = vmatprep.subr.bf16.mxu0 %v2941_v16  ;;  %v1320_v14 = vld [vmem:[#allocation7 + $0x5f4] sm:$0xf]  ;;  %v2079_v8 = vld [vmem:[#allocation7 + $0x318] sm:$0xf] }
 0x1a6   :  { %v1354_v16 = vld [vmem:[#allocation7 + $0x814] sm:$0xf]  ;;  %v2932_v20 = vcombine.low %v1318_v13, %v1320_v14  ;;  %v2081_v13 = vld [vmem:[#allocation7 + $0x358] sm:$0xf] }
 0x1a7   :  { %1924 = vmatmul.mubr.bf16.vlgmr.msra.gmra.mrb[24].mxu1 %v3272_v23  ;;  %2006 = vmatmul.mubr.bf16.vlgmr.msra.gmra.mrb[4].mxu0 %v3272_v23  ;;  %v2959_v23 = vcombine.low %v1354_v16, %v1356_v17  ;;  %v1349_v16 = vld [vmem:[#allocation7 + $0x7cc] sm:$0xff] }
 0x1a8   :  { %1933 = vmatpush1.bf16.msra.mxu1 %v2915_v24  ;;  %3087 = vmatpush3.bf16.msra.mxu0 %v2917_v47  ;;  %v1322_v24 = vld [vmem:[#allocation7 + $0x614] sm:$0xf]  ;;  %v1351_v17 = vld [vmem:[#allocation7 + $0x7ec] sm:$0xff] }
 0x1a9   :  { %1934 = vmatprep.subr.bf16.mxu1 %v2919_v25  ;;  %3088 = vmatprep.subr.bf16.mxu0 %v2944_v29  ;;  %v1324_v47 = vld [vmem:[#allocation7 + $0x634] sm:$0xf]  ;;  %v1327_v25 = vld [vmem:[#allocation7 + $0x66c] sm:$0xff] }
 0x1aa   :  { %1964 = vmatprep.mubr.bf16.mxu1 %v3274_v38  ;;  %2045 = vmatprep.mubr.bf16.mxu0 %v3274_v38  ;;  %v1360_v29 = vld [vmem:[#allocation7 + $0x874] sm:$0xf]  ;;  %v2935_v33 = vcombine.low %v1322_v24, %v1324_v47  ;;  %v2937_v34 = vcombine.high %v1325_v21, %v1327_v25  ;;  %v2065_v24 = vld [vmem:[#allocation7 + $0x158] sm:$0xf] }
 0x1ab   :  { %v2962_v35 = vcombine.low %v1358_v26, %v1360_v29  ;;  %v1328_v38 = vld [vmem:[#allocation7 + $0x674] sm:$0xf]  ;;  %v2066_v47 = vld [vmem:[#allocation7 + $0x178] sm:$0xf] }
 0x1ac   :  { %1935 = vmatpush1.bf16.msra.mxu1 %v2918_v39  ;;  %3089 = vmatpush3.bf16.msra.mxu0 %v2920_v40  ;;  %v1329_v39 = vld [vmem:[#allocation7 + $0x68c] sm:$0xff]  ;;  %v2938_v42 = vcombine.low %v1326_v36, %v1328_v38  ;;  %v2966_v26 = vcombine.low %v2065_v24, %v2066_v47  ;;  %v2067_v38 = vld [vmem:[#allocation7 + $0x198] sm:$0xf] }
 0x1ad   :  { %1936 = vmatprep.subr.bf16.mxu1 %v2922_v41  ;;  %3090 = vmatprep.subr.bf16.mxu0 %v2947_v43  ;;  %v1331_v40 = vld [vmem:[#allocation7 + $0x6ac] sm:$0xff]  ;;  %v2936_v41 = vcombine.low %v1325_v21, %v1327_v25  ;;  %v2954_v25 = vcombine.low %v1349_v16, %v1351_v17  ;;  %v2106_v24 = vld [vmem:[#allocation7 + $0x678] sm:$0xf] }
 0x1ae   :  { %v2940_v43 = vcombine.high %v1329_v39, %v1331_v40  ;;  %v2939_v49 = vcombine.low %v1329_v39, %v1331_v40  ;;  %v1353_v21 = vld [vmem:[#allocation7 + $0x80c] sm:$0xff]  ;;  %v2068_v39 = vld [vmem:[#allocation7 + $0x1b8] sm:$0xf] }
 0x1b0   :  { %1937 = vmatpush1.bf16.msra.mxu1 %v2921_v52  ;;  %3091 = vmatpush3.bf16.msra.mxu0 %v2923_v53  ;;  %v2059_v52 = vld [vmem:[#allocation7 + $0x98] sm:$0xf] }
 0x1b1   :  { %1938 = vmatprep.subr.bf16.mxu1 %v2925_v55  ;;  %3092 = vmatprep.subr.bf16.mxu0 %v2950_v56  ;;  %v2060_v53 = vld [vmem:[#allocation7 + $0xb8] sm:$0xf]  ;;  %v2943_v55 = vcombine.high %v1333_v44, %v1335_v46  ;;  %v3572_v56 = vpop.eup %3275 }
 0x1b2   :  { %v2963_v45 = vcombine.low %v2059_v52, %v2060_v53  ;;  %v2086_v44 = vld [vmem:[#allocation7 + $0x3f8] sm:$0xf] }
 0x1b3   :  { %v2091_v46 = vld [vmem:[#allocation7 + $0x498] sm:$0xf] }
 0x1b4   :  { %1939 = vmatpush1.bf16.msra.mxu1 %v2924_v63  ;;  %3093 = vmatpush3.bf16.msra.mxu0 %v2926_v28  ;;  %v2945_v63 = vcombine.low %v1337_v57, %v1339_v59  ;;  %v2949_v28 = vcombine.high %v1341_v61, %v1343_v62  ;;  %v2071_v57 = vld [vmem:[#allocation7 + $0x218] sm:$0xf] }
 0x1b5   :  { %1940 = vmatprep.subr.bf16.mxu1 %v2928_v0  ;;  %3094 = vmatprep.subr.bf16.mxu0 %v2953_v3  ;;  %v1345_v0 = vld [vmem:[#allocation7 + $0x78c] sm:$0xff]  ;;  %v2077_v3 = vld [vmem:[#allocation7 + $0x2d8] sm:$0xf] }
 0x1b6   :  { %v2972_v5 = vcombine.low %v2077_v3, %v2078_v4  ;;  %v2952_v14 = vcombine.high %v1345_v0, %v1347_v2  ;;  %v3409_v3 = vmov 0.0   ;;  %v2093_v4 = vld [vmem:[#allocation7 + $0x4d8] sm:$0xf] }
 0x1b8   :  { %1941 = vmatpush1.bf16.msra.mxu1 %v2927_v10  ;;  %3095 = vmatpush3.bf16.msra.mxu0 %v2929_v31  ;;  %v2948_v10 = vcombine.low %v1341_v61, %v1343_v62  ;;  %v2964_v31 = vcombine.low %v2061_v1, %v2062_v7  ;;  %v2090_v61 = vld [vmem:[#allocation7 + $0x478] sm:$0xf] }
 0x1b9   :  { %1942 = vmatprep.subr.bf16.mxu1 %v2931_v11  ;;  %3096 = vmatprep.subr.bf16.mxu0 %v2956_v37  ;;  %v2973_v11 = vcombine.low %v2079_v8, %v2080_v9  ;;  %v2064_v37 = vld [vmem:[#allocation7 + $0x138] sm:$0xf] }
 0x1ba   :  { %v2965_v18 = vcombine.low %v2063_v12, %v2064_v37  ;;  %v2094_v1 = vld [vmem:[#allocation7 + $0x4f8] sm:$0xf]  ;;  %v2350_v12 = vld [vmem:[#allocation7 + $0x29c] sm:$0xf] }
 0x1bb   :  { %v2980_v7 = vcombine.low %v2093_v4, %v2094_v1  ;;  %v2095_v8 = vld [vmem:[#allocation7 + $0x518] sm:$0xf] }
 0x1bc   :  { %1943 = vmatpush1.bf16.msra.mxu1 %v2930_v19  ;;  %3097 = vmatpush3.bf16.msra.mxu0 %v2932_v20  ;;  %v2974_v19 = vcombine.low %v2081_v13, %v2082_v15  ;;  %v2951_v20 = vcombine.low %v1345_v0, %v1347_v2  ;;  %v2074_v0 = vld [vmem:[#allocation7 + $0x278] sm:$0xf]  ;;  %v2979_v2 = vcombine.low %v2091_v46, %v2092_v48  ;;  %v2366_v46 = vld [vmem:[#allocation7 + $0x49c] sm:$0xf] }
 0x1bd   :  { %1944 = vmatprep.subr.bf16.mxu1 %v2934_v50  ;;  %3098 = vmatprep.subr.bf16.mxu0 %v2959_v23  ;;  %v2955_v50 = vcombine.high %v1349_v16, %v1351_v17  ;;  %v1355_v23 = vld [vmem:[#allocation7 + $0x82c] sm:$0xff]  ;;  %v2096_v9 = vld [vmem:[#allocation7 + $0x538] sm:$0xf]  ;;  %v2367_v48 = vld [vmem:[#allocation7 + $0x4bc] sm:$0xf] }
 0x1be   :  { %v2958_v29 = vcombine.high %v1353_v21, %v1355_v23  ;;  %v2957_v40 = vcombine.low %v1353_v21, %v1355_v23  ;;  %v2100_v15 = vld [vmem:[#allocation7 + $0x5b8] sm:$0xf] }
 0x1bf   :  { %v2101_v17 = vld [vmem:[#allocation7 + $0x5d8] sm:$0xf] }
 0x1c0   :  { %1945 = vmatpush1.bf16.msra.mxu1 %v2933_v30  ;;  %3099 = vmatpush3.bf16.msra.mxu0 %v2935_v33  ;;  %v1357_v30 = vld [vmem:[#allocation7 + $0x84c] sm:$0xff]  ;;  %v2105_v23 = vld [vmem:[#allocation7 + $0x658] sm:$0xf] }
 0x1c1   :  { %1946 = vmatprep.subr.bf16.mxu1 %v2937_v34  ;;  %3100 = vmatprep.subr.bf16.mxu0 %v2962_v35  ;;  %v1359_v33 = vld [vmem:[#allocation7 + $0x86c] sm:$0xff]  ;;  %v2083_v34 = vld [vmem:[#allocation7 + $0x398] sm:$0xf]  ;;  %v2986_v47 = vcombine.low %v2105_v23, %v2106_v24  ;;  %v2336_v24 = vld [vmem:[#allocation7 + $0xdc] sm:$0xf] }
 0x1c2   :  { %v2084_v35 = vld [vmem:[#allocation7 + $0x3b8] sm:$0xf]  ;;  %v2960_v52 = vcombine.low %v1357_v30, %v1359_v33 }
 0x1c3   :  { %v2975_v36 = vcombine.low %v2083_v34, %v2084_v35  ;;  %v536_v34 = vld [vmem:[#allocation8 + $0x1] ss:$8 sm:$0x7] }
 0x1c4   :  { %1947 = vmatpush1.bf16.msra.mxu1 %v2936_v41  ;;  %3101 = vmatpush3.bf16.msra.mxu0 %v2938_v42  ;;  %v2967_v41 = vcombine.low %v2067_v38, %v2068_v39  ;;  %v2961_v42 = vcombine.high %v1357_v30, %v1359_v33  ;;  %v549_v35 = vrot.slane %v536_v34, %v3543_v6 }
 0x1c5   :  { %1948 = vmatprep.subr.bf16.mxu1 %v2940_v43  ;;  %3108 = vmatprep.subr.bf16.mxu0 %v2971_v51  ;;  %v2085_v43 = vld [vmem:[#allocation7 + $0x3d8] sm:$0xf] }
 0x1c6   :  { %v2976_v58 = vcombine.low %v2085_v43, %v2086_v44  ;;  %v2070_v51 = vld [vmem:[#allocation7 + $0x1f8] sm:$0xf] }
 0x1c7   :  { %2046 = vmatmul.mubr.bf16.vlgmr.msra.gmra.mrb[8].mxu0 %v3572_v56 }
 0x1c8   :  { %1949 = vmatpush1.bf16.msra.mxu1 %v2939_v49  ;;  %3109 = vmatpush3.bf16.msra.mxu0 %v2963_v45  ;;  %v2069_v49 = vld [vmem:[#allocation7 + $0x1d8] sm:$0xf] }
 0x1c9   :  { %1950 = vmatprep.subr.bf16.mxu1 %v2943_v55  ;;  %3110 = vmatprep.subr.bf16.mxu0 %v2972_v5  ;;  %v2968_v53 = vcombine.low %v2069_v49, %v2070_v51  ;;  %v2087_v55 = vld [vmem:[#allocation7 + $0x418] sm:$0xf]  ;;  %v2368_v49 = vld [vmem:[#allocation7 + $0x4dc] sm:$0xf] }
 0x1ca   :  { %v2088_v45 = vld [vmem:[#allocation7 + $0x438] sm:$0xf]  ;;  %v2369_v51 = vld [vmem:[#allocation7 + $0x4fc] sm:$0xf] }
 0x1cb   :  { %v2977_v59 = vcombine.low %v2087_v55, %v2088_v45  ;;  %v2370_v55 = vld [vmem:[#allocation7 + $0x51c] sm:$0xf] }
 0x1cc   :  { %1951 = vmatpush1.bf16.msra.mxu1 %v2942_v54  ;;  %3111 = vmatpush3.bf16.msra.mxu0 %v2964_v31  ;;  %v2072_v54 = vld [vmem:[#allocation7 + $0x238] sm:$0xf]  ;;  %v2371_v45 = vld [vmem:[#allocation7 + $0x53c] sm:$0xf] }
 0x1cd   :  { %1952 = vmatprep.subr.bf16.mxu1 %v2946_v60  ;;  %3112 = vmatprep.subr.bf16.mxu0 %v2973_v11  ;;  %v2089_v60 = vld [vmem:[#allocation7 + $0x458] sm:$0xf]  ;;  %v2969_v62 = vcombine.low %v2071_v57, %v2072_v54  ;;  %v3005_v57 = vcombine.low %v2370_v55, %v2371_v45  ;;  %v2373_v54 = vld [vmem:[#allocation7 + $0x57c] sm:$0xf] }
 0x1ce   :  { %v2097_v31 = vld [vmem:[#allocation7 + $0x558] sm:$0xf] }
 0x1cf   :  { %v2098_v11 = vld [vmem:[#allocation7 + $0x578] sm:$0xf] }
 0x1d0   :  { %1953 = vmatpush1.bf16.msra.mxu1 %v2945_v63  ;;  %3113 = vmatpush3.bf16.msra.mxu0 %v2965_v18  ;;  %v2978_v63 = vcombine.low %v2089_v60, %v2090_v61  ;;  %v2982_v13 = vcombine.low %v2097_v31, %v2098_v11  ;;  %v2102_v18 = vld [vmem:[#allocation7 + $0x5f8] sm:$0xf]  ;;  %v541_v60 = vrot.slane %v536_v34, %v3525_v32 }
 0x1d1   :  { %1954 = vmatprep.subr.bf16.mxu1 %v2949_v28  ;;  %3114 = vmatprep.subr.bf16.mxu0 %v2974_v19  ;;  %v2073_v28 = vld [vmem:[#allocation7 + $0x258] sm:$0xf]  ;;  %v2984_v19 = vcombine.low %v2101_v17, %v2102_v18  ;;  %v2335_v17 = vld [vmem:[#allocation7 + $0xbc] sm:$0xf] }
 0x1d2   :  { %v2970_v5 = vcombine.low %v2073_v28, %v2074_v0  ;;  %v2375_v28 = vld [vmem:[#allocation7 + $0x5bc] sm:$0xf] }
 0x1d4   :  { %1955 = vmatpush1.bf16.msra.mxu1 %v2948_v10  ;;  %3115 = vmatpush3.bf16.msra.mxu0 %v2966_v26  ;;  %v2981_v10 = vcombine.low %v2095_v8, %v2096_v9  ;;  %v2376_v8 = vld [vmem:[#allocation7 + $0x5dc] sm:$0xf] }
 0x1d5   :  { %1956 = vmatprep.subr.bf16.mxu1 %v2952_v14  ;;  %3116 = vmatprep.subr.bf16.mxu0 %v2975_v36  ;;  %v2099_v14 = vld [vmem:[#allocation7 + $0x598] sm:$0xf]  ;;  %v2377_v9 = vld [vmem:[#allocation7 + $0x5fc] sm:$0xf] }
 0x1d6   :  { %v2983_v16 = vcombine.low %v2099_v14, %v2100_v15  ;;  %v2380_v14 = vld [vmem:[#allocation7 + $0x65c] sm:$0xf] }
 0x1d7   :  { %v2381_v15 = vld [vmem:[#allocation7 + $0x67c] sm:$0xf] }
 0x1d8   :  { %1957 = vmatpush1.bf16.msra.mxu1 %v2951_v20  ;;  %3117 = vmatpush3.bf16.msra.mxu0 %v2967_v41  ;;  %v2103_v20 = vld [vmem:[#allocation7 + $0x618] sm:$0xf]  ;;  %v3010_v18 = vcombine.low %v2380_v14, %v2381_v15 }
 0x1d9   :  { %1958 = vmatprep.subr.bf16.mxu1 %v2955_v50  ;;  %3118 = vmatprep.subr.bf16.mxu0 %v2976_v58  ;;  %v2104_v50 = vld [vmem:[#allocation7 + $0x638] sm:$0xf]  ;;  %v3003_v58 = vcombine.low %v2366_v46, %v2367_v48 }
 0x1da   :  { %v2985_v21 = vcombine.low %v2103_v20, %v2104_v50  ;;  %v2353_v20 = vld [vmem:[#allocation7 + $0x2fc] sm:$0xf] }
 0x1dc   :  { %1959 = vmatpush1.bf16.msra.mxu1 %v2954_v25  ;;  %3119 = vmatpush3.bf16.msra.mxu0 %v2968_v53  ;;  %v3004_v53 = vcombine.low %v2368_v49, %v2369_v51  ;;  %v2343_v49 = vld [vmem:[#allocation7 + $0x1bc] sm:$0xf] }
 0x1dd   :  { %1960 = vmatprep.subr.bf16.mxu1 %v2958_v29  ;;  %3120 = vmatprep.subr.bf16.mxu0 %v2977_v59  ;;  %v2372_v59 = vld [vmem:[#allocation7 + $0x55c] sm:$0xf] }
 0x1de   :  { %v3006_v61 = vcombine.low %v2372_v59, %v2373_v54  ;;  %v2360_v51 = vld [vmem:[#allocation7 + $0x3dc] sm:$0xf] }
 0x1df   :  { %v2344_v59 = vld [vmem:[#allocation7 + $0x1dc] sm:$0xf] }
 0x1e0   :  { %1961 = vmatpush1.bf16.msra.mxu1 %v2957_v40  ;;  %3121 = vmatpush3.bf16.msra.mxu0 %v2969_v62  ;;  %v545_v62 = vrot.slane %v536_v34, %v3528_v22  ;;  %v2338_v34 = vld [vmem:[#allocation7 + $0x11c] sm:$0xf] }
 0x1e1   :  { %1962 = vmatprep.subr.bf16.mxu1 %v2961_v42  ;;  %3122 = vmatprep.subr.bf16.mxu0 %v2978_v63  ;;  %v2374_v63 = vld [vmem:[#allocation7 + $0x59c] sm:$0xf] }
 0x1e2   :  { %v3007_v1 = vcombine.low %v2374_v63, %v2375_v28  ;;  %v2345_v54 = vld [vmem:[#allocation7 + $0x1fc] sm:$0xf] }
 0x1e3   :  { %v2363_v63 = vld [vmem:[#allocation7 + $0x43c] sm:$0xf] }
 0x1e4   :  { %1963 = vmatpush1.bf16.msra.mxu1 %v2960_v52  ;;  %3123 = vmatpush3.bf16.msra.mxu0 %v2970_v5 }
 0x1e5   :  { %3179 = vmatprep.subr.bf16.mxu1 %v3409_v3 }
 0x1e7   :  { %1965 = vmatmul.mubr.bf16.vlgmr.msra.gmra.mrb[24].mxu1 %v3572_v56  ;;  %v2351_v56 = vld [vmem:[#allocation7 + $0x2bc] sm:$0xf] }
 0x1e8   :  { %3180 = vmatpush3.bf16.msra.mxu1 %v2979_v2  ;;  %3195 = vmatprep.mubr.msk.bf16.mxu1 %vm3410_vm1, %v3409_v3  ;;  %v2995_v37 = vcombine.low %v2350_v12, %v2351_v56  ;;  %v3008_v12 = vcombine.low %v2376_v8, %v2377_v9  ;;  %v2378_v56 = vld [vmem:[#allocation7 + $0x61c] sm:$0xf] }
 0x1e9   :  { %3181 = vmatprep.subr.bf16.mxu1 %v3409_v3 }
 0x1ea   :  { %3139 = vmatprep.subr.bf16.mxu0 %v2995_v37  ;;  %v2379_v37 = vld [vmem:[#allocation7 + $0x63c] sm:$0xf] }
 0x1ec   :  { %3182 = vmatpush3.bf16.msra.mxu1 %v2980_v7 }
 0x1ed   :  { %3183 = vmatprep.subr.bf16.mxu1 %v3409_v3 }
 0x1f0   :  { %3184 = vmatpush3.bf16.msra.mxu1 %v2981_v10 }
 0x1f1   :  { %3185 = vmatprep.subr.bf16.mxu1 %v3409_v3 }
 0x1f4   :  { %3186 = vmatpush3.bf16.msra.mxu1 %v2982_v13  ;;  %v3009_v13 = vcombine.low %v2378_v56, %v2379_v37 }
 0x1f5   :  { %3187 = vmatprep.subr.bf16.mxu1 %v3409_v3 }
 0x1f8   :  { %3188 = vmatpush3.bf16.msra.mxu1 %v2983_v16  ;;  %v2334_v16 = vld [vmem:[#allocation7 + $0x9c] sm:$0xf] }
 0x1f9   :  { %3189 = vmatprep.subr.bf16.mxu1 %v3409_v3  ;;  %v2987_v50 = vcombine.low %v2334_v16, %v2335_v17 }
 0x1fc   :  { %3190 = vmatpush3.bf16.msra.mxu1 %v2984_v19  ;;  %v2352_v19 = vld [vmem:[#allocation7 + $0x2dc] sm:$0xf] }
 0x1fd   :  { %3191 = vmatprep.subr.bf16.mxu1 %v3409_v3  ;;  %v2996_v23 = vcombine.low %v2352_v19, %v2353_v20 }
 0x200   :  { %3192 = vmatpush3.bf16.msra.mxu1 %v2985_v21 }
 0x201   :  { %3193 = vmatprep.subr.bf16.mxu1 %v3409_v3 }
 0x204   :  { %3194 = vmatpush3.bf16.msra.mxu1 %v2986_v47  ;;  %v2337_v47 = vld [vmem:[#allocation7 + $0xfc] sm:$0xf] }
 0x205   :  { %3199 = vmatprep.subr.bf16.mxu1 %v3409_v3 }
 0x21a   :  { %v3036_v25 = vpop.f32.mrb[16].mxu1 }
 0x21b   :  { %v3037_v26 = vpop.f32.mrb[17].mxu1 }
 0x21c   :  { %v3038_v29 = vadd.f32 %v3037_v26, %v3036_v25  ;;  %v3039_v30 = vpop.f32.mrb[18].mxu1  ;;  %v2354_v26 = vld [vmem:[#allocation7 + $0x31c] sm:$0xf] }
 0x21d   :  { %v3040_v33 = vpop.f32.mrb[19].mxu1  ;;  %v2988_v30 = vcombine.low %v2336_v24, %v2337_v47 }
 0x21e   :  { %v1182_v39 = vadd.f32 %v3038_v29, %v549_v35  ;;  %v2355_v29 = vld [vmem:[#allocation7 + $0x33c] sm:$0xf] }
 0x21f   :  { %v2997_v33 = vcombine.low %v2354_v26, %v2355_v29  ;;  %v2339_v35 = vld [vmem:[#allocation7 + $0x13c] sm:$0xf] }
 0x23a   :  { %v3058_v36 = vpop.f32.mrb[20].mxu1 }
 0x23b   :  { %v3059_v38 = vpop.f32.mrb[21].mxu1 }
 0x23c   :  { %v3060_v40 = vadd.f32 %v3059_v38, %v3058_v36  ;;  %v3061_v41 = vpop.f32.mrb[22].mxu1  ;;  %v2356_v36 = vld [vmem:[#allocation7 + $0x35c] sm:$0xf] }
 0x23d   :  { %v3062_v42 = vpop.f32.mrb[23].mxu1  ;;  %v2357_v38 = vld [vmem:[#allocation7 + $0x37c] sm:$0xf] }
 0x23e   :  { %v1222_v43 = vadd.f32 %v3060_v40, %v1182_v39  ;;  %v2989_v39 = vcombine.low %v2338_v34, %v2339_v35  ;;  %v2998_v40 = vcombine.low %v2356_v36, %v2357_v38  ;;  %v2340_v41 = vld [vmem:[#allocation7 + $0x15c] sm:$0xf]  ;;  %v2610_v34 = vld [vmem:[#allocation7 + $0x6b8] sm:$0xf] }
 0x23f   :  { %v2341_v42 = vld [vmem:[#allocation7 + $0x17c] sm:$0xf] }
 0x240   :  { %v1229_v44 = vpack.c.bf16 %v1222_v43, %v1222_v43  ;;  %v2358_v43 = vld [vmem:[#allocation7 + $0x39c] sm:$0xf]  ;;  %v2990_v46 = vcombine.low %v2340_v41, %v2341_v42  ;;  %v2614_v41 = vld [vmem:[#allocation7 + $0x738] sm:$0xf] }
 0x242   :  { %3277 = vtanh.bf16 %v1229_v44  ;;  %v2359_v44 = vld [vmem:[#allocation7 + $0x3bc] sm:$0xf] }
 0x243   :  { %v2999_v48 = vcombine.low %v2358_v43, %v2359_v44  ;;  %v2615_v43 = vld [vmem:[#allocation7 + $0x758] sm:$0xf] }
 0x244   :  { %v2616_v44 = vld [vmem:[#allocation7 + $0x778] sm:$0xf] }
 0x24d   :  { %v3278_v52 = vpop.eup %3277 }
 0x24e   :  { %3196 = vmatmul.mubr.bf16.vlgmr.msra.gmra.mrb[28].mxu1 %v3278_v52  ;;  %v2361_v52 = vld [vmem:[#allocation7 + $0x3fc] sm:$0xf] }
 0x24f   :  { %3200 = vmatpush3.bf16.msra.mxu1 %v3003_v58  ;;  %3215 = vmatprep.mubr.msk.bf16.mxu1 %vm3410_vm1, %v3409_v3  ;;  %v2342_v58 = vld [vmem:[#allocation7 + $0x19c] sm:$0xf] }
 0x250   :  { %3201 = vmatprep.subr.bf16.mxu1 %v3409_v3  ;;  %v2991_v55 = vcombine.low %v2342_v58, %v2343_v49  ;;  %v2618_v58 = vld [vmem:[#allocation7 + $0x7b8] sm:$0xf] }
 0x253   :  { %3202 = vmatpush3.bf16.msra.mxu1 %v3004_v53 }
 0x254   :  { %3203 = vmatprep.subr.bf16.mxu1 %v3409_v3 }
 0x257   :  { %3204 = vmatpush3.bf16.msra.mxu1 %v3005_v57  ;;  %v3000_v57 = vcombine.low %v2360_v51, %v2361_v52  ;;  %v2619_v51 = vld [vmem:[#allocation7 + $0x7d8] sm:$0xf] }
 0x258   :  { %3205 = vmatprep.subr.bf16.mxu1 %v3409_v3  ;;  %v2620_v52 = vld [vmem:[#allocation7 + $0x7f8] sm:$0xf] }
 0x25a   :  { %v1140_v0 = vpop.f32.mrb[0].mxu0 }
 0x25b   :  { %v3239_v2 = vadd.f32 %v1140_v0, %v541_v60  ;;  %v1142_v4 = vpop.f32.mrb[1].mxu0  ;;  %3206 = vmatpush3.bf16.msra.mxu1 %v3006_v61  ;;  %v2992_v0 = vcombine.low %v2344_v59, %v2345_v54  ;;  %v2623_v59 = vld [vmem:[#allocation7 + $0x858] sm:$0xf] }
 0x25c   :  { %v3240_v5 = vadd.f32 %v1142_v4, %v545_v62  ;;  %v1144_v7 = vpop.f32.mrb[2].mxu0  ;;  %3207 = vmatprep.subr.bf16.mxu1 %v3409_v3  ;;  %v2362_v62 = vld [vmem:[#allocation7 + $0x41c] sm:$0xf]  ;;  %v2624_v54 = vld [vmem:[#allocation7 + $0x878] sm:$0xf] }
 0x25d   :  { %v1227_v10 = vpack.c.bf16 %v3239_v2, %v3239_v2  ;;  %v1145_v31 = vpop.f32.mrb[3].mxu0  ;;  %v3001_v2 = vcombine.low %v2362_v62, %v2363_v63  ;;  %v2346_v4 = vld [vmem:[#allocation7 + $0x21c] sm:$0xf] }
 0x25e   :  { %v1228_v11 = vpack.c.bf16 %v3240_v5, %v3240_v5  ;;  %v2364_v5 = vld [vmem:[#allocation7 + $0x45c] sm:$0xf] }
 0x25f   :  { %3208 = vmatpush3.bf16.msra.mxu1 %v3007_v1  ;;  %v2347_v1 = vld [vmem:[#allocation7 + $0x23c] sm:$0xf] }
 0x260   :  { %3279 = vtanh.bf16 %v1228_v11  ;;  %3209 = vmatprep.subr.bf16.mxu1 %v3409_v3  ;;  %v2365_v7 = vld [vmem:[#allocation7 + $0x47c] sm:$0xf]  ;;  %v2993_v8 = vcombine.low %v2346_v4, %v2347_v1 }
 0x261   :  { %3281 = vtanh.bf16 %v1227_v10  ;;  %v3002_v9 = vcombine.low %v2364_v5, %v2365_v7  ;;  %v2348_v10 = vld [vmem:[#allocation7 + $0x25c] sm:$0xf] }
 0x262   :  { %v2349_v31 = vld [vmem:[#allocation7 + $0x27c] sm:$0xf] }
 0x263   :  { %3210 = vmatpush3.bf16.msra.mxu1 %v3008_v12  ;;  %v2994_v11 = vcombine.low %v2348_v10, %v2349_v31  ;;  %v1362_v12 = vld [vmem:[#allocation8 + $0x2] ss:$8 sm:$0x7] }
 0x264   :  { %3211 = vmatprep.subr.bf16.mxu1 %v3409_v3  ;;  %v1375_v56 = vrot.slane %v1362_v12, %v3543_v6 }
 0x267   :  { %3212 = vmatpush3.bf16.msra.mxu1 %v3009_v13 }
 0x268   :  { %3213 = vmatprep.subr.bf16.mxu1 %v3409_v3 }
 0x26b   :  { %v3280_v21 = vpop.eup %3279  ;;  %3214 = vmatpush3.bf16.msra.mxu1 %v3010_v18 }
 0x26c   :  { %v3282_v25 = vpop.eup %3281  ;;  %2284 = vmatprep.mubr.bf16.mxu0 %v3280_v21  ;;  %v1371_v21 = vrot.slane %v1362_v12, %v3528_v22  ;;  %v2613_v22 = vld [vmem:[#allocation7 + $0x718] sm:$0xf] }
 0x26d   :  { %2285 = vmatmul.mubr.bf16.vlgmr.msra.gmra.mrb[12].mxu0 %v3282_v25  ;;  %v3013_v42 = vcombine.low %v2613_v22, %v2614_v41  ;;  %v2734_v22 = vstv %s2733_s3 }
 0x26e   :  { %3140 = vmatpush3.bf16.msra.mxu0 %v2987_v50  ;;  %v1367_v50 = vrot.slane %v1362_v12, %v3525_v32 }
 0x26f   :  { %3141 = vmatprep.subr.bf16.mxu0 %v2996_v23 }
 0x272   :  { %3142 = vmatpush3.bf16.msra.mxu0 %v2988_v30 }
 0x273   :  { %3143 = vmatprep.subr.bf16.mxu0 %v2997_v33  ;;  %v2609_v33 = vld [vmem:[#allocation7 + $0x698] sm:$0xf] }
 0x274   :  { %v3011_v36 = vcombine.low %v2609_v33, %v2610_v34 }
 0x276   :  { %3144 = vmatpush3.bf16.msra.mxu0 %v2989_v39  ;;  %v2611_v39 = vld [vmem:[#allocation7 + $0x6d8] sm:$0xf] }
 0x277   :  { %3145 = vmatprep.subr.bf16.mxu0 %v2998_v40  ;;  %v2612_v40 = vld [vmem:[#allocation7 + $0x6f8] sm:$0xf] }
 0x278   :  { %v3012_v32 = vcombine.low %v2611_v39, %v2612_v40  ;;  %v2716_v39 = vld [vmem:[#allocation8 + $0x6] ss:$0 sm:$0xff] }
 0x27a   :  { %v3080_v53 = vpop.f32.mrb[4].mxu0  ;;  %3146 = vmatpush3.bf16.msra.mxu0 %v2990_v46  ;;  %v3014_v46 = vcombine.low %v2615_v43, %v2616_v44  ;;  %v2721_v43 = vstv %s3019_s4 }
 0x27b   :  { %v3081_v45 = vpop.f32.mrb[5].mxu0  ;;  %3147 = vmatprep.subr.bf16.mxu0 %v2999_v48  ;;  %v2617_v48 = vld [vmem:[#allocation7 + $0x798] sm:$0xf] }
 0x27c   :  { %v3082_v60 = vadd.f32 %v3081_v45, %v3080_v53  ;;  %v3083_v61 = vpop.f32.mrb[6].mxu0  ;;  %v3015_v49 = vcombine.low %v2617_v48, %v2618_v58  ;;  %v3016_v53 = vcombine.low %v2619_v51, %v2620_v52  ;;  %v2622_v45 = vld [vmem:[#allocation7 + $0x838] sm:$0xf] }
 0x27d   :  { %v3084_v28 = vpop.f32.mrb[7].mxu0 }
 0x27e   :  { %3148 = vmatpush3.bf16.msra.mxu0 %v2991_v55  ;;  %v2008_v37 = vadd.f32 %v3082_v60, %v1375_v56  ;;  %v2621_v55 = vld [vmem:[#allocation7 + $0x818] sm:$0xf]  ;;  %v3018_v60 = vcombine.low %v2623_v59, %v2624_v54 }
 0x27f   :  { %3149 = vmatprep.subr.bf16.mxu0 %v3000_v57  ;;  %v3017_v57 = vcombine.low %v2621_v55, %v2622_v45 }
 0x282   :  { %3150 = vmatpush3.bf16.msra.mxu0 %v2992_v0 }
 0x283   :  { %3151 = vmatprep.subr.bf16.mxu0 %v3001_v2  ;;  %v2107_v2 = vld [vmem:[#allocation8 + $0x3] ss:$0 sm:$0xff] }
 0x286   :  { %3152 = vmatpush3.bf16.msra.mxu0 %v2993_v8 }
 0x287   :  { %3153 = vmatprep.subr.bf16.mxu0 %v3002_v9 }
 0x28a   :  { %3154 = vmatpush3.bf16.msra.mxu0 %v2994_v11 }
 0x28b   :  { %3219 = vmatprep.subr.bf16.mxu0 %v3409_v3 }
 0x29a   :  { %v3102_v13 = vpop.f32.mrb[8].mxu0 }
 0x29b   :  { %v3103_v14 = vpop.f32.mrb[9].mxu0 }
 0x29c   :  { %v3104_v15 = vadd.f32 %v3103_v14, %v3102_v13  ;;  %v3105_v16 = vpop.f32.mrb[10].mxu0  ;;  %v2382_v14 = vld [vmem:[#allocation8 + $0x4] ss:$0 sm:$0xff] }
 0x29d   :  { %v3106_v17 = vpop.f32.mrb[11].mxu0 }
 0x29e   :  { %v2048_v18 = vadd.f32 %v3104_v15, %v2008_v37 }
 0x2a0   :  { %v2055_v19 = vpack.c.bf16 %v2048_v18, %v2048_v18 }
 0x2a2   :  { %3283 = vtanh.bf16 %v2055_v19 }
 0x2ad   :  { %v3284_v20 = vpop.eup %3283 }
 0x2ae   :  { %3216 = vmatmul.mubr.bf16.vlgmr.msra.gmra.mrb[32].mxu1 %v3284_v20  ;;  %v2625_v20 = vld [vmem:[#allocation8 + $0x5] ss:$0 sm:$0xff] }
 0x2ba   :  { %v1966_v23 = vpop.f32.mrb[24].mxu1 }
 0x2bb   :  { %v3241_v24 = vadd.f32 %v1966_v23, %v1367_v50  ;;  %v1968_v47 = vpop.f32.mrb[25].mxu1 }
 0x2bc   :  { %v3242_v25 = vadd.f32 %v1968_v47, %v1371_v21  ;;  %v1970_v6 = vpop.f32.mrb[26].mxu1 }
 0x2bd   :  { %v2053_v26 = vpack.c.bf16 %v3241_v24, %v3241_v24  ;;  %v1971_v29 = vpop.f32.mrb[27].mxu1  ;;  %v2723_v6 = vld [vmem:[#allocation5] sm:$0xff] }
 0x2be   :  { %v2054_v30 = vpack.c.bf16 %v3242_v25, %v3242_v25 }
 0x2bf   :  { %3285 = vtanh.bf16 %v2053_v26 }
 0x2c0   :  { %3287 = vtanh.bf16 %v2054_v30  ;;  %v2726_v30 = vld [vmem:[#allocation8 + $0x7] ss:$0 sm:$0xff] }
 0x2ca   :  { %v3286_v35 = vpop.eup %3285 }
 0x2cb   :  { %v3288_v38 = vpop.eup %3287 }
 0x2cc   :  { %2559 = vmatprep.mubr.bf16.mxu0 %v3288_v38 }
 0x2cd   :  { %2560 = vmatmul.mubr.bf16.vlgmr.msra.gmra.mrb[16].mxu0 %v3286_v35 }
 0x2ce   :  { %3220 = vmatpush3.bf16.msra.mxu0 %v3011_v36  ;;  %3235 = vmatprep.mubr.msk.bf16.mxu0 %vm3410_vm1, %v3409_v3 }
 0x2cf   :  { %3221 = vmatprep.subr.bf16.mxu0 %v3409_v3 }
 0x2d2   :  { %3222 = vmatpush3.bf16.msra.mxu0 %v3012_v32  ;;  %v2737_v32 = vand.u32 127, %v103_v27 }
 0x2d3   :  { %3223 = vmatprep.subr.bf16.mxu0 %v3409_v3 }
 0x2d4   :  { %vm2738_vm3 = vcmp.eq.s32.totalorder %v2737_v32, 0  ;;  %vm2740_vm4 = vcmp.eq.s32.totalorder %v2737_v32, 1 }
 0x2d6   :  { %3224 = vmatpush3.bf16.msra.mxu0 %v3013_v42 }
 0x2d7   :  { %3225 = vmatprep.subr.bf16.mxu0 %v3409_v3 }
 0x2da   :  { %3226 = vmatpush3.bf16.msra.mxu0 %v3014_v46 }
 0x2db   :  { %3227 = vmatprep.subr.bf16.mxu0 %v3409_v3 }
 0x2de   :  { %3228 = vmatpush3.bf16.msra.mxu0 %v3015_v49 }
 0x2df   :  { %3229 = vmatprep.subr.bf16.mxu0 %v3409_v3 }
 0x2e2   :  { %3230 = vmatpush3.bf16.msra.mxu0 %v3016_v53 }
 0x2e3   :  { %3231 = vmatprep.subr.bf16.mxu0 %v3409_v3 }
 0x2e6   :  { %3232 = vmatpush3.bf16.msra.mxu0 %v3017_v57 }
 0x2e7   :  { %3233 = vmatprep.subr.bf16.mxu0 %v3409_v3 }
 0x2ea   :  { %3234 = vmatpush3.bf16.msra.mxu0 %v3018_v60 }
 0x321   :  { %v2326_v61 = vpop.f32.mrb[28].mxu1 }
 0x322   :  { %v3197_v62 = vpop.f32.mrb[29].mxu1 }
 0x323   :  { %v2329_v63 = vpop.f32.mrb[30].mxu1 }
 0x324   :  { %v3198_v28 = vpop.f32.mrb[31].mxu1 }
 0x340   :  { %v3124_v0 = vpop.f32.mrb[12].mxu0 }
 0x341   :  { %v3125_v4 = vpop.f32.mrb[13].mxu0 }
 0x342   :  { %v3126_v1 = vadd.f32 %v3125_v4, %v3124_v0  ;;  %v3127_v5 = vpop.f32.mrb[14].mxu0 }
 0x343   :  { %v3128_v7 = vpop.f32.mrb[15].mxu0 }
 0x344   :  { %v2287_v8 = vadd.f32 %v3126_v1, %v2107_v2 }
 0x346   :  { %v2327_v9 = vadd.f32 %v2326_v61, %v2287_v8 }
 0x348   :  { %v2332_v10 = vpack.c.bf16 %v2327_v9, %v2327_v9 }
 0x34a   :  { %3289 = vtanh.bf16 %v2332_v10 }
 0x355   :  { %v3290_v31 = vpop.eup %3289 }
 0x356   :  { %3236 = vmatmul.mubr.bf16.vlgmr.msra.gmra.mrb[20].mxu0 %v3290_v31 }
 0x381   :  { %v2601_v11 = vpop.f32.mrb[32].mxu1 }
 0x382   :  { %v3217_v12 = vpop.f32.mrb[33].mxu1 }
 0x383   :  { %v2604_v3 = vpop.f32.mrb[34].mxu1 }
 0x384   :  { %v3218_v56 = vpop.f32.mrb[35].mxu1 }
 0x3a0   :  { %v3155_v37 = vpop.f32.mrb[16].mxu0 }
 0x3a1   :  { %v3156_v13 = vpop.f32.mrb[17].mxu0 }
 0x3a2   :  { %v3157_v15 = vadd.f32 %v3156_v13, %v3155_v37  ;;  %v3158_v16 = vpop.f32.mrb[18].mxu0 }
 0x3a3   :  { %v3159_v17 = vpop.f32.mrb[19].mxu0 }
 0x3a4   :  { %v2562_v18 = vadd.f32 %v3157_v15, %v2382_v14 }
 0x3a6   :  { %v2602_v19 = vadd.f32 %v2601_v11, %v2562_v18 }
 0x3a8   :  { %v2607_v21 = vpack.c.bf16 %v2602_v19, %v2602_v19 }
 0x429   :  { %v2708_v50 = vpop.f32.mrb[20].mxu0 }
 0x42a   :  { %v2709_v23 = vadd.f32 %v2708_v50, %v2625_v20  ;;  %v3237_v24 = vpop.f32.mrb[21].mxu0 }
 0x42b   :  { %v2711_v47 = vpop.f32.mrb[22].mxu0 }
 0x42c   :  { %3291 = vtanh.f32 %v2709_v23  ;;  %v3238_v25 = vpop.f32.mrb[23].mxu0 }
 0x42d   :  { %3293 = vtanh.bf16 %v2607_v21 }
 0x436   :  { %v3292_v26 = vpop.eup %3291 }
 0x437   :  { %v2724_v29 = vsub.f32 %v2723_v6, %v3292_v26 }
 0x438   :  { %v3294_v33 = vpop.eup %3293 }
 0x439   :  { %v2725_v34 = vmul.f32 %v2724_v29, %v2724_v29  ;;  %v2715_v36 = vunpack.c.l.bf16 %v3294_v33 }
 0x43b   :  { %v2727_v35 = vmul.f32 %v2726_v30, %v2725_v34  ;;  %v2717_v40 = vmul.f32 %v2716_v39, %v2715_v36 }
 0x43d   :  { %v2729_v38 = vsel %vm2728_vm2, %v2727_v35, 0.0 }
 0x43e   :  { %2730 = vadd.xlane.f32.xlu0 %v2729_v38 }
 0x442   :  { %2718 = vadd.xlane.f32.xlu0 %v2717_v40 }
 0x4cb   :  { %v2731_v41 = vpop.xlane.xlu0 %2730 }
 0x4cc   :  { %v2732_v42 = vmul.f32 -0.5, %v2731_v41 }
 0x4ce   :  { %v2735_v44 = vadd.f32 %v2734_v22, %v2732_v42 }
 0x4cf   :  { %v2719_v46 = vpop.xlane.xlu0 %2718 }
 0x4d0   :  { %v2739_v48 = vsel %vm2738_vm3, %v2735_v44, 0.0  ;;  %v2722_v58 = vadd.f32 %v2721_v43, %v2719_v46 }
 0x4d2   :  { %v2741_v49 = vsel %vm2740_vm4, %v2722_v58, %v2739_v48 }
 0x4d3   :  { %2742 = vst.msk [vmem:[%s3623_s5] sm:$0xff] %vm2728_vm2, %v2741_v49 }
 0x4d4   :  { %2747 = vsyncpa [#allocation3], 1 }
 0x4d5   :  { %2748 = vsyncpa [#allocation6], 1 }
 0x4d6   :  { %2749 = vsyncpa [#allocation9], 1 }
 0x4d7   :  { %2750 = vsyncpa [#allocation4], 1 }

</bundles_post_ra>
